<compile_context>
chip_gen: v5e
topology: v5e:2x2
jax: 0.10.0
libtpu: 0.0.40
codegen_flags: <defaults>
</compile_context>

<pallas_src>
import jax
import jax.numpy as jnp
from jax.experimental import pallas as pl
from jax.experimental.pallas import tpu as pltpu

EPS = 1e-12  # matches nn.LayerNorm((256,), eps=1e-12) in the original module


def _fused_kernel(x1_ref, x2_ref, w_ref, bias_ref, o_ref):
    # add (f32)
    x = x1_ref[...] + x2_ref[...]                           # (TM, H)

    # LayerNorm statistics in a single fused pass (affine already folded into W/bias)
    h = x.shape[-1]
    inv_h = 1.0 / h
    s1 = jnp.sum(x, axis=-1, keepdims=True)                 # sum(x)
    s2 = jnp.sum(x * x, axis=-1, keepdims=True)             # sum(x^2)
    mean = s1 * inv_h
    # Clamp: E[x^2] - mean^2 can round slightly negative -> NaN through rsqrt.
    var = jnp.maximum(s2 * inv_h - mean * mean, 0.0)
    xn = (x - mean) * jax.lax.rsqrt(var + EPS)               # (TM, H), f32

    # Linear (with folded LayerNorm affine): bf16 x bf16 on the MXU, f32 accumulation
    y = jnp.dot(xn.astype(jnp.bfloat16), w_ref[...],
                preferred_element_type=jnp.float32)
    o_ref[...] = (y + bias_ref[...]).astype(o_ref.dtype)


def prepare_params(gamma, beta, w, bias):
    """ONE-TIME preprocessing (run once at model load, never per call).

    Folds the LayerNorm elementwise affine into the Linear:
      (xn*gamma + beta) @ W + b  ==  xn @ (diag(gamma) @ W) + (beta @ W + b)
    and casts the fused weight to bf16 exactly once.
    """
    w_fused = (gamma[:, None] * w).astype(jnp.bfloat16)      # (H, O) bf16
    bias_fused = (beta @ w + bias).astype(jnp.float32)       # (O,)   f32
    return w_fused, bias_fused


def fused_add_layernorm_linear(x273, x239, w_fused, bias_fused, *,
                               tm=96, out_dtype=None):
    B, S, H = x273.shape
    O = w_fused.shape[1]
    rows = B * S
    assert rows % tm == 0, "row count must be divisible by tile size"
    if out_dtype is None:
        out_dtype = x273.dtype  # f32 by default: matches the PyTorch module

    x1 = x273.reshape(rows, H)
    x2 = x239.reshape(rows, H)
    bias2 = bias_fused.reshape(1, O)

    # Grid-invariant operands: constant index_map -> a second pipeline buffer is wasted.
    invariant = dict(pipeline_mode=pl.Buffered(buffer_count=1))

    out_bytes = jnp.dtype(out_dtype).itemsize
    cost = pl.CostEstimate(
        flops=2 * rows * H * O,
        transcendentals=rows,                                  # one rsqrt per row
        bytes_accessed=(2 * rows * H * 4                       # two f32 inputs
                        + H * O * 2                            # bf16 fused weight
                        + rows * O * out_bytes                 # output
                        + O * 4),                              # fused bias
    )

    out = pl.pallas_call(
        _fused_kernel,
        out_shape=jax.ShapeDtypeStruct((rows, O), out_dtype),
        grid_spec=pltpu.PrefetchScalarGridSpec(
            num_scalar_prefetch=0,
            grid=(rows // tm,),
            in_specs=[
                pl.BlockSpec((tm, H), lambda i: (i, 0)),                 # x273 tile
                pl.BlockSpec((tm, H), lambda i: (i, 0)),                 # x239 tile
                pl.BlockSpec((H, O), lambda i: (0, 0), **invariant),     # fused weight (bf16)
                pl.BlockSpec((1, O), lambda i: (0, 0), **invariant),     # fused bias
            ],
            out_specs=pl.BlockSpec((tm, O), lambda i: (i, 0)),
        ),
        compiler_params=pltpu.CompilerParams(
            dimension_semantics=("parallel",),
        ),
        cost_estimate=cost,
    )(x1, x2, w_fused, bias2)

    return out.reshape(B, S, O)


def reference(x273, x239, gamma, beta, w, bias):
    x = x273 + x239
    mean = jnp.mean(x, axis=-1, keepdims=True)
    var = jnp.mean((x - mean) ** 2, axis=-1, keepdims=True)
    xn = (x - mean) * jax.lax.rsqrt(var + EPS)
    xn = xn * gamma + beta
    return jnp.einsum("bsh,ho->bso", xn, w) + bias


if __name__ == "__main__":
    B, S, H, O = 1, 384, 256, 1024

    key = jax.random.PRNGKey(0)
    k1, k2, k3, k4, k5, k6 = jax.random.split(key, 6)

    x273 = jax.random.normal(k1, (B, S, H), dtype=jnp.float32)
    x239 = jax.random.normal(k2, (B, S, H), dtype=jnp.float32)

    # LayerNorm params (PyTorch default: weight=1, bias=0; perturb deterministically)
    gamma = jnp.ones((H,), jnp.float32) + 0.01 * jax.random.normal(k3, (H,), jnp.float32)
    beta = 0.01 * jax.random.normal(k4, (H,), jnp.float32)

    # Linear(256 -> 1024): PyTorch weight is (O, H); store transposed (H, O) for x @ W
    bound = 1.0 / (H ** 0.5)
    w_t = jax.random.uniform(k5, (O, H), jnp.float32, -bound, bound)
    w = w_t.T
    bias = jax.random.uniform(k6, (O,), jnp.float32, -bound, bound)

    # One-time preprocessing (outside the hot path): affine fold + bf16 weight.
    w_fused, bias_fused = prepare_params(gamma, beta, w, bias)
    w_fused, bias_fused = jax.block_until_ready((w_fused, bias_fused))

    out = fused_add_layernorm_linear(x273, x239, w_fused, bias_fused, tm=96)
    out = jax.block_until_ready(out)

    ref = reference(x273, x239, gamma, beta, w, bias)
    assert out.shape == (B, S, O)
    # Tolerance relaxed vs the pure-f32 reference because the matmul runs in bf16
    # (f32 accumulation) on the MXU with the LayerNorm affine folded into W/bias.
    assert jnp.allclose(out, ref, atol=3e-2, rtol=3e-2), "mismatch vs reference"

    print("KERNEL_OK")
</pallas_src>

<mosaic_0001>
module attributes {stable_mosaic.version = 11 : i64} {
  func.func @_fused_kernel(%arg0: i32, %arg1: memref<96x256xf32, #tpu.memory_space<vmem>>, %arg2: memref<96x256xf32, #tpu.memory_space<vmem>>, %arg3: memref<256x1024xbf16, #tpu.memory_space<vmem>>, %arg4: memref<1x1024xf32, #tpu.memory_space<vmem>>, %arg5: memref<96x1024xf32, #tpu.memory_space<vmem>>) attributes {dimension_semantics = [#tpu.dimension_semantics<parallel>], iteration_bounds = array<i64: 4>, scalar_prefetch = 0 : i64, scratch_operands = 0 : i64, tpu.core_type = #tpu.core_type<tc>, window_params = [{transform_indices = @transform_0, window_bounds = array<i64: 96, 256>}, {transform_indices = @transform_1, window_bounds = array<i64: 96, 256>}, {pipeline_mode = #tpu.pipeline_mode<synchronous>, transform_indices = @transform_2, window_bounds = array<i64: 256, 1024>}, {pipeline_mode = #tpu.pipeline_mode<synchronous>, transform_indices = @transform_3, window_bounds = array<i64: 1, 1024>}, {transform_indices = @transform_4, window_bounds = array<i64: 96, 1024>}]} {
    %c0 = arith.constant 0 : index
    %c0_0 = arith.constant 0 : index
    %0 = vector.load %arg1[%c0, %c0_0] : memref<96x256xf32, #tpu.memory_space<vmem>>, vector<96x256xf32>
    %c0_1 = arith.constant 0 : index
    %c0_2 = arith.constant 0 : index
    %1 = vector.load %arg2[%c0_1, %c0_2] : memref<96x256xf32, #tpu.memory_space<vmem>>, vector<96x256xf32>
    %2 = arith.addf %0, %1 : vector<96x256xf32>
    %cst = arith.constant dense<0.000000e+00> : vector<96xf32>
    %3 = vector.multi_reduction <add>, %2, %cst [1] : vector<96x256xf32> to vector<96xf32>
    %4 = vector.shape_cast %3 : vector<96xf32> to vector<96x1xf32>
    %5 = arith.mulf %2, %2 : vector<96x256xf32>
    %cst_3 = arith.constant dense<0.000000e+00> : vector<96xf32>
    %6 = vector.multi_reduction <add>, %5, %cst_3 [1] : vector<96x256xf32> to vector<96xf32>
    %7 = vector.shape_cast %6 : vector<96xf32> to vector<96x1xf32>
    %cst_4 = arith.constant 3.906250e-03 : f32
    %8 = vector.broadcast %cst_4 : f32 to vector<96x1xf32>
    %9 = arith.mulf %4, %8 : vector<96x1xf32>
    %cst_5 = arith.constant 3.906250e-03 : f32
    %10 = vector.broadcast %cst_5 : f32 to vector<96x1xf32>
    %11 = arith.mulf %7, %10 : vector<96x1xf32>
    %12 = arith.mulf %9, %9 : vector<96x1xf32>
    %13 = arith.subf %11, %12 : vector<96x1xf32>
    %cst_6 = arith.constant 0.000000e+00 : f32
    %14 = vector.broadcast %cst_6 : f32 to vector<96x1xf32>
    %15 = arith.maximumf %13, %14 : vector<96x1xf32>
    %16 = vector.broadcast %9 : vector<96x1xf32> to vector<96x256xf32>
    %17 = arith.subf %2, %16 : vector<96x256xf32>
    %cst_7 = arith.constant 9.99999996E-13 : f32
    %18 = vector.broadcast %cst_7 : f32 to vector<96x1xf32>
    %19 = arith.addf %15, %18 : vector<96x1xf32>
    %20 = math.rsqrt %19 : vector<96x1xf32>
    %21 = vector.broadcast %20 : vector<96x1xf32> to vector<96x256xf32>
    %22 = arith.mulf %17, %21 : vector<96x256xf32>
    %23 = arith.truncf %22 : vector<96x256xf32> to vector<96x256xbf16>
    %c0_8 = arith.constant 0 : index
    %c0_9 = arith.constant 0 : index
    %24 = vector.load %arg3[%c0_8, %c0_9] : memref<256x1024xbf16, #tpu.memory_space<vmem>>, vector<256x1024xbf16>
    %cst_10 = arith.constant dense<0.000000e+00> : vector<96x1024xf32>
    %25 = tpu.matmul %23, %24, %cst_10 {dimension_numbers = #tpu.dot_dimension_numbers<[1], [0], [0], [1], [0, 0, 1, 1], [], []>} : vector<96x256xbf16>, vector<256x1024xbf16>, vector<96x1024xf32> -> vector<96x1024xf32>
    %c0_11 = arith.constant 0 : index
    %c0_12 = arith.constant 0 : index
    %26 = vector.load %arg4[%c0_11, %c0_12] : memref<1x1024xf32, #tpu.memory_space<vmem>>, vector<1x1024xf32>
    %27 = vector.broadcast %26 : vector<1x1024xf32> to vector<96x1024xf32>
    %28 = arith.addf %25, %27 : vector<96x1024xf32>
    %c0_13 = arith.constant 0 : index
    %c0_14 = arith.constant 0 : index
    %29 = vector.load %arg5[%c0_13, %c0_14] : memref<96x1024xf32, #tpu.memory_space<vmem>>, vector<96x1024xf32>
    tpu.vector_store %arg5[%c0_13, %c0_14], %28 {strides = array<i32>} : memref<96x1024xf32, #tpu.memory_space<vmem>>, vector<96x1024xf32>,
    return
  }
  func.func @transform_0(%arg0: i32) -> (i32, i32) {
    %c0_i32 = arith.constant 0 : i32
    %c0_i32_0 = arith.constant 0 : i32
    return %arg0, %c0_i32 : i32, i32
  }
  func.func @transform_1(%arg0: i32) -> (i32, i32) {
    %c0_i32 = arith.constant 0 : i32
    %c0_i32_0 = arith.constant 0 : i32
    return %arg0, %c0_i32 : i32, i32
  }
  func.func @transform_2(%arg0: i32) -> (i32, i32) {
    %c0_i32 = arith.constant 0 : i32
    %c0_i32_0 = arith.constant 0 : i32
    %c0_i32_1 = arith.constant 0 : i32
    return %c0_i32, %c0_i32_0 : i32, i32
  }
  func.func @transform_3(%arg0: i32) -> (i32, i32) {
    %c0_i32 = arith.constant 0 : i32
    %c0_i32_0 = arith.constant 0 : i32
    %c0_i32_1 = arith.constant 0 : i32
    return %c0_i32, %c0_i32_0 : i32, i32
  }
  func.func @transform_4(%arg0: i32) -> (i32, i32) {
    %c0_i32 = arith.constant 0 : i32
    %c0_i32_0 = arith.constant 0 : i32
    return %arg0, %c0_i32 : i32, i32
  }
}

</mosaic_0001>

<bundles_post_ra>
// kernel: tpu_custom_call.1
= control target key start
LH: loop header
LB: loop body
LE: loop exit
PB: predicated region body
PF: predicated region fallthrough
CT: control target
= control target key end

     0   :  { %s4316_s0 = inlined_call_operand.hbm [shape: f32[384,256], index: 0, kind: input, shape index: {}]   ;;  %s4317_s1 = inlined_call_operand.hbm [shape: f32[384,256], index: 1, kind: input, shape index: {}]   ;;  %s4318_s2 = inlined_call_operand.hbm [shape: bf16[256,1024], index: 2, kind: input, shape index: {}]   ;;  %s4319_s3 = inlined_call_operand.hbm [shape: f32[1,1024], index: 3, kind: input, shape index: {}]   ;;  %s4320_s4 = inlined_call_operand.hbm [shape: f32[384,1024], index: 4, kind: output, shape index: {}]  }
   0x1   :  { %4322 = sst [smem:[#allocation17_spill]] %s4318_s2 }
   0x2   :  { %4323 = sst [smem:[#allocation18_spill]] %s4319_s3 }
   0x3   :  { %9 = vsyncpa [#allocation3], 0 }
   0x4   :  { %11 = vsyncpa [#allocation3 + $0x1], 0 }
   0x5   :  { %12 = vsyncpa [#allocation6], 0 }
   0x6   :  { %14 = vsyncpa [#allocation6 + $0x1], 0 }
   0x7   :  { %15 = vsyncpa [#allocation9], 0 }
   0x8   :  { %16 = vsyncpa [#allocation4], 0 }
   0x9   :  { %18 = vsyncpa [#allocation4 + $0x1], 0  ;;  %s3359_s15 = smov 0   ;;  %s3361_s16 = smov 0  }
   0xa   :  { %s3363_s17 = smov 0   ;;  %s3365_s18 = smov 0  }
   0xb LB: > { %s3380_s19 = sadd.s32 4294967295, %s3324_s18   ;;  %s2354_s20 = sadd.s32 4294967294, %s3324_s18   ;;  %s3324_s18 = sphi %s3365_s18, %s4347_s18   ;;  %s3320_s17 = sphi %s3363_s17, %s4346_s17   ;;  %s3316_s16 = sphi %s3361_s16, %s4345_s16   ;;  %s3312_s15 = sphi %s3359_s15, %s4344_s15  }
   0xc   : > { %p44_p0 = scmp.ne.s32.totalorder %s3316_s16, %s3312_s15  ;;  %p45_p1 = scmp.eq.s32.totalorder %s3380_s19, 0 }
   0xd   : > { %p136_p2 = scmp.eq.s32.totalorder %s3380_s19, 3  ;;  %p142_p3 = scmp.eq.s32.totalorder %s2354_s20, 3 }
   0xe   : > { %p3389_p4 = por %p45_p1, %p44_p0  ;;  %p2355_p5 = scmp.ge.s32.totalorder %s3324_s18, 1 }
   0xf   : > { %p3394_p6 = por %p142_p3, %p44_p0  ;;  %p149_p7 = scmp.lt.s32.totalorder %s3324_s18, 5 }
  0x10   : > { %s4326_s2 = sld [smem:[#allocation17_spill]]  ;;  %s3326_s27 = smov [#allocation7]  }
  0x11   : > { %p3402_p8 = pnand %p2355_p5, %p149_p7  ;;  %s162_s28 = sshll.u32 %s3326_s27, 4  ;;  %s163_s28 = int_to_ptr.vmem [resolvable:$true] %s162_s28 }
  0x12   : > { %s4328_s3 = sld [smem:[#allocation18_spill]]  ;;  %s3327_s6 = smov 512  }
  0x13   : > { %p3037_p9 = pneg %p3402_p8  ;;  %s3328_s7 = smov 32  }
  0x14   : > { %s3329_s8 = smov [#allocation8]   ;;  %s3414_s10 = sadd.s32 1, %s3324_s18  }
  0x15   : > { %p3038_p10 = pnand %p3037_p9, %p45_p1  ;;  %s177_s9 = sshll.u32 %s3329_s8, 4  ;;  %s178_s9 = int_to_ptr.vmem [resolvable:$true] %s177_s9 }
  0x16   : > { %s160_s25 = sshll.u32 %s4326_s2, 4  ;;  %s31_s11 = sadd.s32 1, %s3320_s17  ;;  %s161_s25 = int_to_ptr.hbm [resolvable:$true] %s160_s25 }
  0x17   : > { %3040 = dma.hbm_to_vmem [thread:$0]  (!%p3038_p10), %s161_s25, 16384, %s163_s28, [#allocation6], %s3327_s6, %s3327_s6, %s3328_s7  }
  0x18   : > { %s175_s5 = sshll.u32 %s4328_s3, 4  ;;  %s28_s12 = ssub.s32 %s3324_s18, %s3414_s10  ;;  %s176_s5 = int_to_ptr.hbm [resolvable:$true] %s175_s5 }
  0x19   : > { %3043 = dma.hbm_to_vmem [thread:$0]  (!%p3038_p10), %s176_s5, 128, %s178_s9, [#allocation9]  }
  0x1a   : > { %p38_p11 = scmp.ne.s32.totalorder %s3320_s17, %s3316_s16  ;;  %p29_p12 = scmp.eq.s32.totalorder %s28_s12, 0 }
  0x1b   : > { %p39_p13 = scmp.eq.s32.totalorder %s3324_s18, 0  ;;  %p3057_p3 = scmp.lt.s32.totalorder %s3324_s18, 4 }
  0x1c   : > { %p3424_p0 = por %p136_p2, %p38_p11  ;;  %s188_s20 = sand.u32 1, %s3320_s17  }
  0x1d   : > { %s3430_s14 = scalar_select %p29_p12, %s3320_s17, %s31_s11  }
  0x1e   : > { %p40_p5 = por %p39_p13, %p38_p11  ;;  %s3433_s23 = smul.u32 192, %s188_s20 }
  0x1f   : > { %4330 = sst [smem:[#allocation16_spill]] %s3430_s14  ;;  %s4321_s24 = smul.u32 192, %s3324_s18 }
  0x20   : > { %p3436_p7 = pnand %p3057_p3, %p40_p5  ;;  %s192_s30 = scalar_lea.vmem [#allocation2], %s3433_s23 }
  0x21   : > { %s198_s29 = scalar_lea.hbm %s4316_s0, %s4321_s24  ;;  %s201_s5 = sshll.u32 %s192_s30, 4  ;;  %s202_s5 = int_to_ptr.vmem [resolvable:$true] %s201_s5 }
  0x22   : > { %s199_s6 = sshll.u32 %s198_s29, 4  ;;  %s211_s7 = sand.u32 1, %s3324_s18   ;;  %s200_s6 = int_to_ptr.hbm [resolvable:$true] %s199_s6 }
  0x23   : > { %s189_s8 = scalar_lea.sflag [#allocation3], %s188_s20  ;;  %s3186_s9 = sshra.s32 %s200_s6, 4  ;;  %s3187_s9 = int_to_ptr.hbm [resolvable:$true] %s3186_s9 }
  0x24   : > { %s3188_s11 = scalar_lea.hbm %s3187_s9, 192  ;;  %p3190_p9 = pneg %p3436_p7 }
  0x25   : > { %p3189_p2 = scmp.ne.s32.totalorder %s3187_s9, %s3188_s11  ;;  %s3193_s28 = scalar_lea.hbm %s4316_s0, 768 }
  0x26   : > { %p3194_p12 = scmp.lt.s32.totalorder %s3187_s9, %s4316_s0  ;;  %p3195_p13 = scmp.lt.s32.totalorder %s3193_s28, %s3188_s11 }
  0x27   : > { %p3191_p10 = pnand %p3190_p9, %p3189_p2 }
  0x28   : > { %p3196_p3 = por %p3195_p13, %p3194_p12 }
  0x29   : > { %p3192_p11 = pneg %p3191_p10 }
  0x2b   : > { %p3197_p5 = pnand %p3196_p3, %p3192_p11 }
  0x2d   : > { %3200 = shalt.err (!%p3197_p5)
}
  0x2e   : > { %s3330_s20 = smov 256   ;;  %s3331_s24 = smov 16  }
  0x2f   : > { %3047 = dma.hbm_to_vmem [thread:$0]  (!%p3436_p7), %s200_s6, 3072, %s202_s5, %s189_s8, %s3330_s20, %s3330_s20, %s3331_s24  }
  0x30   : > { %s4332_s2 = smul.u32 192, %s3324_s18  ;;  %s215_s14 = scalar_lea.vmem [#allocation5], %s3433_s23 }
  0x31   : > { %s224_s30 = sshll.u32 %s215_s14, 4  ;;  %s212_s11 = scalar_lea.sflag [#allocation6], %s211_s7  ;;  %s225_s30 = int_to_ptr.vmem [resolvable:$true] %s224_s30 }
  0x32   : > { %s221_s27 = scalar_lea.hbm %s4317_s1, %s4332_s2  ;;  %s3223_s8 = scalar_lea.hbm %s4317_s1, 768 }
  0x33   : > { %s222_s9 = sshll.u32 %s221_s27, 4  ;;  %s223_s9 = int_to_ptr.hbm [resolvable:$true] %s222_s9 }
  0x34   : > { %s3216_s28 = sshra.s32 %s223_s9, 4  ;;  %s3217_s28 = int_to_ptr.hbm [resolvable:$true] %s3216_s28 }
  0x35   : > { %s3218_s29 = scalar_lea.hbm %s3217_s28, 192  ;;  %p3224_p12 = scmp.lt.s32.totalorder %s3217_s28, %s4317_s1 }
  0x36   : > { %p3219_p2 = scmp.ne.s32.totalorder %s3217_s28, %s3218_s29  ;;  %p3225_p13 = scmp.lt.s32.totalorder %s3223_s8, %s3218_s29 }
  0x38   : > { %p3221_p10 = pnand %p3219_p2, %p3190_p9  ;;  %p3226_p3 = por %p3225_p13, %p3224_p12 }
  0x3a   : > { %p3222_p11 = pneg %p3221_p10 }
  0x3c   : > { %p3227_p5 = pnand %p3226_p3, %p3222_p11 }
  0x3e   : > { %3230 = shalt.err (!%p3227_p5)
}
  0x3f   : > { %3050 = dma.hbm_to_vmem [thread:$0]  (!%p3436_p7), %s223_s9, 3072, %s225_s30, %s212_s11, %s3330_s20, %s3330_s20, %s3331_s24  }
  0x40   : > { %236 = sbr.rel (%p3402_p8) target bundleno = 757 (0x2f5), region = 36  ;;  %s3480_s14 = sand.u32 (!%p3402_p8), 1, %s3316_s16  }
  0x41   : > { %s3021_s23 = smul.u32 (!%p3402_p8), 192, %s3480_s14  ;;  %s239_s7 = scalar_lea.sflag (!%p3402_p8), [#allocation3], %s3480_s14 }
  0x43   : > { %s3484_s12 = scalar_lea.vmem (!%p3402_p8), [#allocation2], %s3021_s23 }
  0x45   : > { %3291 = dma.done.wait (%p3389_p4), %s239_s7, 3072  }
  0x46   : > { %3293 = vsyncadd (%p3389_p4), %s239_s7, 4294964224  ;;  %s248_s24 = sand.u32 1, %s3380_s19   ;;  %s3491_s25 = scalar_lea.vmem [#allocation5], %s3021_s23 }
  0x47   : > { %s249_s26 = scalar_lea.sflag [#allocation6], %s248_s24 }
  0x48   : > { %3295 = dma.done.wait (%p3389_p4), %s249_s26, 3072  }
  0x49   : > { %3297 = vsyncadd (%p3389_p4), %s249_s26, 4294964224 }
  0x4a   : > { %3299 = dma.done.wait (%p45_p1), [#allocation6], 16384  }
  0x4b   : > { %3301 = vsyncadd (%p45_p1), [#allocation6], 4294950912 }
  0x4c   : > { %3303 = dma.done.wait (%p45_p1), [#allocation9], 128  }
  0x4d   : > { %3305 = vsyncadd (%p45_p1), [#allocation9], 4294967168  ;;  %v296_v0 = vld [vmem:[%s3484_s12] sm:$0xff]  ;;  %v297_v1 = vld [vmem:[%s3484_s12 + $0x8] sm:$0xff]  ;;  %s3022_s21 = smul.u32 768, %s3480_s14  ;;  %s3266_s2 = scalar_lea.hbm %s4320_s4, 3072 }
  0x4e   : > { %v320_v2 = vld [vmem:[%s3491_s25] sm:$0xff]  ;;  %v321_v3 = vld [vmem:[%s3491_s25 + $0x8] sm:$0xff]  ;;  %v298_v10 = vld [vmem:[%s3484_s12 + $0x10] sm:$0xff]  ;;  %s3018_s27 = smul.u32 768, %s3380_s19  ;;  %s2223_s19 = scalar_lea.sflag [#allocation4], %s3480_s14 }
  0x4f   : > { %v3509_v4 = vadd.f32 %v320_v2, %v296_v0  ;;  %v300_v5 = vld [vmem:[%s3484_s12 + $0x20] sm:$0xff]  ;;  %v301_v6 = vld [vmem:[%s3484_s12 + $0x28] sm:$0xff]  ;;  %v3513_v7 = vadd.f32 %v321_v3, %v297_v1  ;;  %v299_v14 = vld [vmem:[%s3484_s12 + $0x18] sm:$0xff]  ;;  %s4013_s20 = scalar_lea.vmem [#allocation10], %s3022_s21 }
  0x50   : > { %v324_v8 = vld [vmem:[%s3491_s25 + $0x20] sm:$0xff]  ;;  %v325_v9 = vld [vmem:[%s3491_s25 + $0x28] sm:$0xff]  ;;  %v322_v15 = vld [vmem:[%s3491_s25 + $0x10] sm:$0xff]  ;;  %s2235_s11 = scalar_lea.hbm %s4320_s4, %s3018_s27  ;;  %s2236_s28 = sshll.u32 %s4013_s20, 4  ;;  %s2237_s28 = int_to_ptr.vmem [resolvable:$true] %s2236_s28 }
  0x51   : > { %v3518_v11 = vadd.f32 %v324_v8, %v300_v5  ;;  %v3520_v12 = vadd.f32 %v325_v9, %v301_v6  ;;  %v404_v13 = vmul.f32 %v3509_v4, %v3509_v4  ;;  %v323_v16 = vld [vmem:[%s3491_s25 + $0x18] sm:$0xff]  ;;  %v368_v17 = vadd.f32 %v3513_v7, %v3509_v4  ;;  %v302_v21 = vld [vmem:[%s3484_s12 + $0x30] sm:$0xff]  ;;  %v304_v33 = vld [vmem:[%s3484_s12 + $0x40] sm:$0xff]  ;;  %s2238_s29 = sshll.u32 %s2235_s11, 4  ;;  %s2239_s29 = int_to_ptr.hbm [resolvable:$true] %s2238_s29 }
  0x52   : > { %v405_v18 = vmul.f32 %v3513_v7, %v3513_v7  ;;  %v3531_v19 = vadd.f32 %v322_v15, %v298_v10  ;;  %v3533_v20 = vadd.f32 %v323_v16, %v299_v14  ;;  %v303_v22 = vld [vmem:[%s3484_s12 + $0x38] sm:$0xff]  ;;  %v326_v23 = vld [vmem:[%s3491_s25 + $0x30] sm:$0xff]  ;;  %v305_v35 = vld [vmem:[%s3484_s12 + $0x48] sm:$0xff]  ;;  %s3260_s5 = sshra.s32 %s2239_s29, 4  ;;  %s3261_s5 = int_to_ptr.hbm [resolvable:$true] %s3260_s5 }
  0x53   : > { %v374_v24 = vadd.f32 %v3520_v12, %v3518_v11  ;;  %v327_v25 = vld [vmem:[%s3491_s25 + $0x38] sm:$0xff]  ;;  %369 = vadd.xlane.f32.xlu0 %v368_v17  ;;  %v3541_v27 = vadd.f32 %v326_v23, %v302_v21  ;;  %v328_v36 = vld [vmem:[%s3491_s25 + $0x40] sm:$0xff]  ;;  %v329_v37 = vld [vmem:[%s3491_s25 + $0x48] sm:$0xff]  ;;  %v408_v38 = vmul.f32 %v3518_v11, %v3518_v11  ;;  %v409_v39 = vmul.f32 %v3520_v12, %v3520_v12  ;;  %s3262_s6 = scalar_lea.hbm %s3261_s5, 768  ;;  %p3267_p7 = scmp.lt.s32.totalorder %s3261_s5, %s4320_s4 }
  0x54   : > { %v428_v26 = vadd.f32 %v405_v18, %v404_v13  ;;  %v3543_v28 = vadd.f32 %v327_v25, %v303_v22  ;;  %v406_v29 = vmul.f32 %v3531_v19, %v3531_v19  ;;  %v407_v30 = vmul.f32 %v3533_v20, %v3533_v20  ;;  %v306_v42 = vld [vmem:[%s3484_s12 + $0x50] sm:$0xff]  ;;  %v307_v45 = vld [vmem:[%s3484_s12 + $0x58] sm:$0xff]  ;;  %v308_v55 = vld [vmem:[%s3484_s12 + $0x60] sm:$0xff]  ;;  %p3263_p1 = scmp.ne.s32.totalorder %s3261_s5, %s3262_s6  ;;  %p3268_p9 = scmp.lt.s32.totalorder %s3266_s2, %s3262_s6 }
  0x55   : > { %375 = vadd.xlane.f32.xlu2 %v374_v24  ;;  %v371_v31 = vadd.f32 %v3533_v20, %v3531_v19  ;;  %v3561_v40 = vadd.f32 %v328_v36, %v304_v33  ;;  %v3563_v41 = vadd.f32 %v329_v37, %v305_v35  ;;  %v410_v43 = vmul.f32 %v3541_v27, %v3541_v27  ;;  %v330_v46 = vld [vmem:[%s3491_s25 + $0x50] sm:$0xff]  ;;  %v331_v47 = vld [vmem:[%s3491_s25 + $0x58] sm:$0xff]  ;;  %v309_v58 = vld [vmem:[%s3484_s12 + $0x68] sm:$0xff] }
  0x56   : > { %429 = vadd.xlane.f32.xlu1 %v428_v26  ;;  %v377_v32 = vadd.f32 %v3543_v28, %v3541_v27  ;;  %v431_v34 = vadd.f32 %v407_v30, %v406_v29  ;;  %v411_v44 = vmul.f32 %v3543_v28, %v3543_v28  ;;  %v434_v48 = vadd.f32 %v409_v39, %v408_v38  ;;  %v332_v59 = vld [vmem:[%s3491_s25 + $0x60] sm:$0xff]  ;;  %v333_v60 = vld [vmem:[%s3491_s25 + $0x68] sm:$0xff]  ;;  %v310_v2 = vld [vmem:[%s3484_s12 + $0x70] sm:$0xff]  ;;  %p3264_p4 = pnand %p3263_p1, %p3424_p0  ;;  %p3269_p2 = por %p3268_p9, %p3267_p7 }
  0x57   : > { %v380_v49 = vadd.f32 %v3563_v41, %v3561_v40  ;;  %v3575_v50 = vadd.f32 %v330_v46, %v306_v42  ;;  %v3577_v51 = vadd.f32 %v331_v47, %v307_v45  ;;  %v412_v56 = vmul.f32 %v3561_v40, %v3561_v40  ;;  %v311_v3 = vld [vmem:[%s3484_s12 + $0x78] sm:$0xff]  ;;  %v334_v5 = vld [vmem:[%s3491_s25 + $0x70] sm:$0xff]  ;;  %v312_v16 = vld [vmem:[%s3484_s12 + $0x80] sm:$0xff] }
  0x58   : > { %v437_v52 = vadd.f32 %v411_v44, %v410_v43  ;;  %v413_v57 = vmul.f32 %v3563_v41, %v3563_v41  ;;  %v3593_v63 = vadd.f32 %v332_v59, %v308_v55  ;;  %v3595_v0 = vadd.f32 %v333_v60, %v309_v58  ;;  %v335_v6 = vld [vmem:[%s3491_s25 + $0x78] sm:$0xff]  ;;  %v314_v17 = vld [vmem:[%s3484_s12 + $0x90] sm:$0xff]  ;;  %v313_v24 = vld [vmem:[%s3484_s12 + $0x88] sm:$0xff]  ;;  %p3265_p8 = pneg %p3264_p4 }
  0x59   : > { %v414_v53 = vmul.f32 %v3575_v50, %v3575_v50  ;;  %v415_v54 = vmul.f32 %v3577_v51, %v3577_v51  ;;  %v383_v61 = vadd.f32 %v3577_v51, %v3575_v50  ;;  %v3605_v10 = vadd.f32 %v334_v5, %v310_v2  ;;  %v315_v21 = vld [vmem:[%s3484_s12 + $0x98] sm:$0xff]  ;;  %v338_v22 = vld [vmem:[%s3491_s25 + $0x90] sm:$0xff]  ;;  %v336_v25 = vld [vmem:[%s3491_s25 + $0x80] sm:$0xff] }
  0x5a   : > { %v440_v1 = vadd.f32 %v413_v57, %v412_v56  ;;  %v416_v8 = vmul.f32 %v3593_v63, %v3593_v63  ;;  %v417_v9 = vmul.f32 %v3595_v0, %v3595_v0  ;;  %v3607_v13 = vadd.f32 %v335_v6, %v311_v3  ;;  %v339_v23 = vld [vmem:[%s3491_s25 + $0x98] sm:$0xff]  ;;  %v337_v26 = vld [vmem:[%s3491_s25 + $0x88] sm:$0xff]  ;;  %v316_v37 = vld [vmem:[%s3484_s12 + $0xa0] sm:$0xff]  ;;  %p3270_p10 = pnand %p3269_p2, %p3265_p8 }
  0x5b   : > { %372 = vadd.xlane.f32.xlu0 %v371_v31  ;;  %v443_v62 = vadd.f32 %v415_v54, %v414_v53  ;;  %v386_v14 = vadd.f32 %v3595_v0, %v3593_v63  ;;  %v418_v29 = vmul.f32 %v3605_v10, %v3605_v10  ;;  %v3625_v31 = vadd.f32 %v338_v22, %v314_v17  ;;  %v317_v39 = vld [vmem:[%s3484_s12 + $0xa8] sm:$0xff]  ;;  %v340_v42 = vld [vmem:[%s3491_s25 + $0xa0] sm:$0xff]  ;;  %v319_v53 = vld [vmem:[%s3484_s12 + $0xb8] sm:$0xff] }
  0x5c   : > { %v446_v15 = vadd.f32 %v417_v9, %v416_v8  ;;  %v389_v18 = vadd.f32 %v3607_v13, %v3605_v10  ;;  %v419_v30 = vmul.f32 %v3607_v13, %v3607_v13  ;;  %v3629_v33 = vadd.f32 %v336_v25, %v312_v16  ;;  %v341_v43 = vld [vmem:[%s3491_s25 + $0xa8] sm:$0xff]  ;;  %v342_v54 = vld [vmem:[%s3491_s25 + $0xb0] sm:$0xff]  ;;  %v343_v55 = vld [vmem:[%s3491_s25 + $0xb8] sm:$0xff] }
  0x5d   : > { %378 = vadd.xlane.f32.xlu2 %v377_v32  ;;  %v3627_v32 = vadd.f32 %v339_v23, %v315_v21  ;;  %v3645_v46 = vadd.f32 %v340_v42, %v316_v37  ;;  %v3647_v47 = vadd.f32 %v341_v43, %v317_v39  ;;  %v3661_v59 = vadd.f32 %v343_v55, %v319_v53  ;;  %v2592_v8 = vld [vmem:[#allocation7 + $0x1c0] sm:$0xf]  ;;  %v2942_v17 = vld [vmem:[#allocation7 + $0x1c4] sm:$0xf] }
  0x5e   : > { %432 = vadd.xlane.f32.xlu1 %v431_v34  ;;  %v3631_v34 = vadd.f32 %v337_v26, %v313_v24  ;;  %v449_v35 = vadd.f32 %v419_v30, %v418_v29  ;;  %v420_v44 = vmul.f32 %v3629_v33, %v3629_v33  ;;  %v2946_v9 = vld [vmem:[#allocation7 + $0x1dc] sm:$0xf0]  ;;  %v3006_v23 = vld [vmem:[#allocation7 + $0x3c4] sm:$0xf] }
  0x5f   : > { %v395_v36 = vadd.f32 %v3627_v32, %v3625_v31  ;;  %v398_v57 = vadd.f32 %v3647_v47, %v3645_v46  ;;  %v425_v2 = vmul.f32 %v3647_v47, %v3647_v47  ;;  %v3010_v16 = vld [vmem:[#allocation7 + $0x3dc] sm:$0xf0]  ;;  %v2850_v24 = vld [vmem:[#allocation7 + $0x3e0] sm:$0xf0] }
  0x60   : > { %v392_v38 = vadd.f32 %v3631_v34, %v3629_v33  ;;  %v421_v45 = vmul.f32 %v3631_v34, %v3631_v34  ;;  %v2853_v25 = vor.u32 %v3006_v23, %v2850_v24  ;;  %v2560_v26 = vld [vmem:[#allocation7 + $0x180] sm:$0xf]  ;;  %v2934_v37 = vld [vmem:[#allocation7 + $0x184] sm:$0xf] }
  0x61   : > { %v2938_v29 = vld [vmem:[#allocation7 + $0x19c] sm:$0xf0]  ;;  %v2998_v43 = vld [vmem:[#allocation7 + $0x384] sm:$0xf] }
  0x62   : > { %v452_v56 = vadd.f32 %v421_v45, %v420_v44  ;;  %1619 = vmatpush.bf16.msra.mxu3 %v2853_v25  ;;  %v2816_v30 = vld [vmem:[#allocation7 + $0x380] sm:$0xf]  ;;  %v2818_v44 = vld [vmem:[#allocation7 + $0x3a0] sm:$0xf0] }
  0x63   : > { %435 = vadd.xlane.f32.xlu0 %v434_v48  ;;  %v318_v48 = vld [vmem:[%s3484_s12 + $0xb0] sm:$0xff]  ;;  %v2821_v45 = vor.u32 %v2998_v43, %v2818_v44  ;;  %v2926_v55 = vld [vmem:[#allocation7 + $0x144] sm:$0xf]  ;;  %v2914_v23 = vld [vmem:[#allocation7 + $0xdc] sm:$0xf0] }
  0x64   : > { %v3659_v58 = vadd.f32 %v342_v54, %v318_v48  ;;  %v2528_v48 = vld [vmem:[#allocation7 + $0x140] sm:$0xf] }
  0x65   : > { %381 = vadd.xlane.f32.xlu2 %v380_v49  ;;  %v422_v49 = vmul.f32 %v3625_v31, %v3625_v31  ;;  %v2994_v54 = vld [vmem:[#allocation7 + $0x35c] sm:$0xf0] }
  0x66   : > { %438 = vadd.xlane.f32.xlu1 %v437_v52  ;;  %v423_v52 = vmul.f32 %v3627_v32, %v3627_v32  ;;  %v401_v3 = vadd.f32 %v3661_v59, %v3659_v58  ;;  %1620 = vmatpush.bf16.msra.mxu3 %v2821_v45  ;;  %v2720_v24 = vld [vmem:[#allocation7 + $0x2c0] sm:$0xf] }
  0x67   : > { %v2906_v43 = vld [vmem:[#allocation7 + $0x9c] sm:$0xf0] }
  0x68   : > { %v455_v60 = vadd.f32 %v423_v52, %v422_v49  ;;  %v2930_v49 = vld [vmem:[#allocation7 + $0x15c] sm:$0xf0] }
  0x69   : > { %v2784_v52 = vld [vmem:[#allocation7 + $0x340] sm:$0xf]  ;;  %v2529_v53 = vor.u32 %v2930_v49, %v2528_v48  ;;  %v2902_v49 = vld [vmem:[#allocation7 + $0x84] sm:$0xf] }
  0x6a   : > { %v2688_v44 = vld [vmem:[#allocation7 + $0x280] sm:$0xf] }
  0x6b   : > { %384 = vadd.xlane.f32.xlu0 %v383_v61  ;;  %v426_v61 = vmul.f32 %v3659_v58, %v3659_v58  ;;  %v2970_v48 = vld [vmem:[#allocation7 + $0x29c] sm:$0xf0] }
  0x6d   : > { %444 = vadd.xlane.f32.xlu2 %v443_v62  ;;  %v427_v62 = vmul.f32 %v3661_v59, %v3661_v59 }
  0x6e   : > { %441 = vadd.xlane.f32.xlu1 %v440_v1  ;;  %v424_v1 = vmul.f32 %v3645_v46, %v3645_v46 }
  0x6f   : > { %v461_v5 = vadd.f32 %v427_v62, %v426_v61  ;;  %v2990_v61 = vld [vmem:[#allocation7 + $0x344] sm:$0xf] }
  0x70   : > { %v458_v6 = vadd.f32 %v425_v2, %v424_v1  ;;  %v2786_v62 = vld [vmem:[#allocation7 + $0x360] sm:$0xf0]  ;;  %v2496_v2 = vld [vmem:[#allocation7 + $0x100] sm:$0xf] }
  0x71   : > { %v2789_v1 = vor.u32 %v2990_v61, %v2786_v62 }
  0x73   : > { %387 = vadd.xlane.f32.xlu0 %v386_v14  ;;  %v2848_v14 = vld [vmem:[#allocation7 + $0x3c0] sm:$0xf]  ;;  %1621 = vmatpush.bf16.msra.mxu3 %v2789_v1 }
  0x74   : > { %v2849_v21 = vor.u32 %v3010_v16, %v2848_v14  ;;  %v2498_v14 = vld [vmem:[#allocation7 + $0x120] sm:$0xf0]  ;;  %v2400_v1 = vld [vmem:[#allocation7 + $0x40] sm:$0xf] }
  0x75   : > { %447 = vadd.xlane.f32.xlu2 %v446_v15  ;;  %v2593_v15 = vor.u32 %v2946_v9, %v2592_v8  ;;  %v2986_v8 = vld [vmem:[#allocation7 + $0x31c] sm:$0xf0]  ;;  %v2918_v9 = vld [vmem:[#allocation7 + $0x104] sm:$0xf] }
  0x76   : > { %390 = vadd.xlane.f32.xlu1 %v389_v18  ;;  %v2594_v18 = vld [vmem:[#allocation7 + $0x1e0] sm:$0xf0]  ;;  %1541 = vmatpush.bf16.msra.mxu1 %v2849_v21  ;;  %v2501_v16 = vor.u32 %v2918_v9, %v2498_v14 }
  0x77   : > { %v2597_v22 = vor.u32 %v2942_v17, %v2594_v18  ;;  %1502 = vmatpush.bf16.msra.mxu0 %v2593_v15  ;;  %v2982_v17 = vld [vmem:[#allocation7 + $0x304] sm:$0xf] }
  0x78   : > { %v2754_v18 = vld [vmem:[#allocation7 + $0x320] sm:$0xf0] }
  0x79   : > { %1580 = vmatpush.bf16.msra.mxu2 %v2597_v22  ;;  %v2757_v21 = vor.u32 %v2982_v17, %v2754_v18  ;;  %v2464_v22 = vld [vmem:[#allocation7 + $0xc0] sm:$0xf]  ;;  %v2958_v18 = vld [vmem:[#allocation7 + $0x244] sm:$0xf] }
  0x7a   : > { %v2465_v25 = vor.u32 %v2914_v23, %v2464_v22 }
  0x7b   : > { %450 = vadd.xlane.f32.xlu0 %v449_v35  ;;  %v2561_v35 = vor.u32 %v2938_v29, %v2560_v26  ;;  %1622 = vmatpush.bf16.msra.mxu3 %v2757_v21  ;;  %v2978_v26 = vld [vmem:[#allocation7 + $0x2dc] sm:$0xf0]  ;;  %v2910_v29 = vld [vmem:[#allocation7 + $0xc4] sm:$0xf] }
  0x7c   : > { %v2658_v21 = vld [vmem:[#allocation7 + $0x260] sm:$0xf0] }
  0x7d   : > { %396 = vadd.xlane.f32.xlu2 %v395_v36  ;;  %v3002_v36 = vld [vmem:[#allocation7 + $0x39c] sm:$0xf0]  ;;  %1503 = vmatpush.bf16.msra.mxu0 %v2561_v35  ;;  %v2721_v35 = vor.u32 %v2978_v26, %v2720_v24  ;;  %v2661_v24 = vor.u32 %v2958_v18, %v2658_v21 }
  0x7e   : > { %393 = vadd.xlane.f32.xlu1 %v392_v38  ;;  %v2562_v38 = vld [vmem:[#allocation7 + $0x1a0] sm:$0xf0]  ;;  %v2817_v39 = vor.u32 %v3002_v36, %v2816_v30 }
  0x7f   : > { %v2565_v42 = vor.u32 %v2934_v37, %v2562_v38  ;;  %v2466_v30 = vld [vmem:[#allocation7 + $0xe0] sm:$0xf0] }
  0x80   : > { %1542 = vmatpush.bf16.msra.mxu1 %v2817_v39  ;;  %v2469_v36 = vor.u32 %v2910_v29, %v2466_v30  ;;  %v2974_v37 = vld [vmem:[#allocation7 + $0x2c4] sm:$0xf]  ;;  %v2368_v29 = vld [vmem:[#allocation7] sm:$0xf] }
  0x81   : > { %1581 = vmatpush.bf16.msra.mxu2 %v2565_v42  ;;  %1504 = vmatpush.bf16.msra.mxu0 %v2529_v53  ;;  %v2722_v38 = vld [vmem:[#allocation7 + $0x2e0] sm:$0xf0]  ;;  %v2432_v42 = vld [vmem:[#allocation7 + $0x80] sm:$0xf]  ;;  %v2689_v53 = vor.u32 %v2970_v48, %v2688_v44 }
  0x82   : > { %v2725_v39 = vor.u32 %v2974_v37, %v2722_v38  ;;  %v2433_v45 = vor.u32 %v2906_v43, %v2432_v42  ;;  %v2890_v30 = vld [vmem:[#allocation7 + $0x1c] sm:$0xf0]  ;;  %v2370_v48 = vld [vmem:[#allocation7 + $0x20] sm:$0xf0] }
  0x83   : > { %453 = vadd.xlane.f32.xlu0 %v452_v56  ;;  %v2530_v56 = vld [vmem:[#allocation7 + $0x160] sm:$0xf0]  ;;  %v2954_v42 = vld [vmem:[#allocation7 + $0x21c] sm:$0xf0] }
  0x84   : > { %1623 = vmatpush.bf16.msra.mxu3 %v2725_v39  ;;  %v2369_v39 = vor.u32 %v2890_v30, %v2368_v29 }
  0x85   : > { %399 = vadd.xlane.f32.xlu2 %v398_v57  ;;  %v2785_v57 = vor.u32 %v2994_v54, %v2784_v52  ;;  %v2434_v52 = vld [vmem:[#allocation7 + $0xa0] sm:$0xf0] }
  0x86   : > { %456 = vadd.xlane.f32.xlu1 %v455_v60  ;;  %v2533_v60 = vor.u32 %v2926_v55, %v2530_v56  ;;  %v2437_v54 = vor.u32 %v2902_v49, %v2434_v52  ;;  %v2966_v55 = vld [vmem:[#allocation7 + $0x284] sm:$0xf] }
  0x87   : > { %1543 = vmatpush.bf16.msra.mxu1 %v2785_v57  ;;  %v2690_v56 = vld [vmem:[#allocation7 + $0x2a0] sm:$0xf0] }
  0x88   : > { %1582 = vmatpush.bf16.msra.mxu2 %v2533_v60  ;;  %v2693_v60 = vor.u32 %v2966_v55, %v2690_v56  ;;  %v2950_v52 = vld [vmem:[#allocation7 + $0x204] sm:$0xf] }
  0x8a   : > { %1624 = vmatpush.bf16.msra.mxu3 %v2693_v60 }
  0x8b   : > { %402 = vadd.xlane.f32.xlu0 %v401_v3  ;;  %v2922_v3 = vld [vmem:[#allocation7 + $0x11c] sm:$0xf0] }
  0x8c   : > { %1583 = vmatpush.bf16.msra.mxu2 %v2501_v16  ;;  %v2402_v16 = vld [vmem:[#allocation7 + $0x60] sm:$0xf0] }
  0x8d   : > { %462 = vadd.xlane.f32.xlu2 %v461_v5  ;;  %v2752_v5 = vld [vmem:[#allocation7 + $0x300] sm:$0xf] }
  0x8e   : > { %459 = vadd.xlane.f32.xlu1 %v458_v6  ;;  %v2497_v6 = vor.u32 %v2922_v3, %v2496_v2  ;;  %v2753_v15 = vor.u32 %v2986_v8, %v2752_v5  ;;  %v2898_v2 = vld [vmem:[#allocation7 + $0x5c] sm:$0xf0]  ;;  %1625 = vmatpush.bf16.msra.mxu3 %v2661_v24 }
  0x8f   : > { %v2401_v5 = vor.u32 %v2898_v2, %v2400_v1  ;;  %v2962_v8 = vld [vmem:[#allocation7 + $0x25c] sm:$0xf0] }
  0x90   : > { %1505 = vmatpush.bf16.msra.mxu0 %v2497_v6  ;;  %1544 = vmatpush.bf16.msra.mxu1 %v2753_v15  ;;  %v2656_v6 = vld [vmem:[#allocation7 + $0x240] sm:$0xf]  ;;  %v2894_v15 = vld [vmem:[#allocation7 + $0x44] sm:$0xf] }
  0x91   : > { %1584 = vmatpush.bf16.msra.mxu2 %v2469_v36  ;;  %v2657_v17 = vor.u32 %v2962_v8, %v2656_v6  ;;  %v2405_v23 = vor.u32 %v2894_v15, %v2402_v16 }
  0x94   : > { %1506 = vmatpush.bf16.msra.mxu0 %v2465_v25  ;;  %1545 = vmatpush.bf16.msra.mxu1 %v2721_v35  ;;  %v2624_v35 = vld [vmem:[#allocation7 + $0x200] sm:$0xf] }
  0x95   : > { %1585 = vmatpush.bf16.msra.mxu2 %v2437_v54  ;;  %v2625_v44 = vor.u32 %v2954_v42, %v2624_v35 }
  0x98   : > { %1507 = vmatpush.bf16.msra.mxu0 %v2433_v45  ;;  %1546 = vmatpush.bf16.msra.mxu1 %v2689_v53  ;;  %v2886_v45 = vld [vmem:[#allocation7 + $0x4] sm:$0xf] }
  0x99   : > { %1586 = vmatpush.bf16.msra.mxu2 %v2405_v23  ;;  %v2626_v53 = vld [vmem:[#allocation7 + $0x220] sm:$0xf0] }
  0x9a   : > { %v2629_v60 = vor.u32 %v2950_v52, %v2626_v53 }
  0x9c   : > { %1508 = vmatpush.bf16.msra.mxu0 %v2401_v5  ;;  %1547 = vmatpush.bf16.msra.mxu1 %v2657_v17 }
  0x9d   : > { %1626 = vmatpush.bf16.msra.mxu3 %v2629_v60 }
  0xa0   : > { %1509 = vmatpush.bf16.msra.mxu0 %v2369_v39  ;;  %1548 = vmatpush.bf16.msra.mxu1 %v2625_v44 }
  0xc6   : > { %v370_v57 = vpop.xlane.xlu0 %369 }
  0xc7   : > { %v3673_v61 = vmul.f32 0.00390625, %v370_v57  ;;  %v2373_v57 = vor.u32 %v2886_v45, %v2370_v48 }
  0xc8   : > { %v376_v62 = vpop.xlane.xlu2 %375 }
  0xc9   : > { %v430_v3 = vpop.xlane.xlu1 %429  ;;  %v488_v14 = vmul.f32 %v3673_v61, %v3673_v61  ;;  %v3681_v49 = vmul.f32 0.00390625, %v376_v62  ;;  %1587 = vmatpush.bf16.msra.mxu2 %v2373_v57 }
  0xca   : > { %v476_v9 = vmul.f32 0.00390625, %v430_v3 }
  0xcb   : > { %v490_v2 = vmul.f32 %v3681_v49, %v3681_v49 }
  0xcc   : > { %v500_v22 = vsub.f32 %v476_v9, %v488_v14 }
  0xce   : > { %v512_v25 = vmax.f32 %v500_v22, 0.0  ;;  %v373_v26 = vpop.xlane.xlu0 %372 }
  0xcf   : > { %v3679_v37 = vmul.f32 0.00390625, %v373_v26 }
  0xd0   : > { %v3677_v36 = vadd.f32 1e-12, %v512_v25  ;;  %v379_v38 = vpop.xlane.xlu2 %378 }
  0xd1   : > { %v433_v43 = vpop.xlane.xlu1 %432  ;;  %v489_v55 = vmul.f32 %v3679_v37, %v3679_v37  ;;  %v3686_v56 = vmul.f32 0.00390625, %v379_v38 }
  0xd2   : > { %3101 = vrsqrt.f32 %v3677_v36  ;;  %v477_v54 = vmul.f32 0.00390625, %v433_v43  ;;  %vm566_vm1 = vweird.f32 %v3677_v36 }
  0xd3   : > { %v491_v9 = vmul.f32 %v3686_v56, %v3686_v56 }
  0xd4   : > { %v501_v1 = vsub.f32 %v477_v54, %v489_v55 }
  0xd6   : > { %v513_v62 = vmax.f32 %v501_v1, 0.0  ;;  %v436_v3 = vpop.xlane.xlu0 %435 }
  0xd7   : > { %v478_v6 = vmul.f32 0.00390625, %v436_v3  ;;  %v524_v3 = vsub.f32 %v3509_v4, %v3673_v61 }
  0xd8   : > { %v3102_v5 = vpop.eup %3101  ;;  %v382_v8 = vpop.xlane.xlu2 %381  ;;  %v549_v15 = vadd.f32 1e-12, %v513_v62 }
  0xd9   : > { %v561_v14 = vmul.f32 %v3102_v5, %v3677_v36  ;;  %v439_v16 = vpop.xlane.xlu1 %438  ;;  %v502_v17 = vsub.f32 %v478_v6, %v490_v2  ;;  %v3695_v26 = vmul.f32 0.00390625, %v382_v8  ;;  %vm567_vm0 = vweird.f32 %v3102_v5 }
  0xda   : > { %v479_v18 = vmul.f32 0.00390625, %v439_v16  ;;  %3103 = vrsqrt.f32 %v549_v15  ;;  %v525_v16 = vsub.f32 %v3513_v7, %v3673_v61  ;;  %vm568_vm2 = vmor %vm566_vm1, %vm567_vm0  ;;  %vm576_vm4 = vweird.f32 %v549_v15 }
  0xdb   : > { %v562_v21 = vmul.f32 %v3102_v5, %v561_v14  ;;  %v514_v22 = vmax.f32 %v502_v17, 0.0  ;;  %v492_v52 = vmul.f32 %v3695_v26, %v3695_v26  ;;  %v526_v7 = vsub.f32 %v3531_v19, %v3679_v37 }
  0xdc   : > { %v503_v23 = vsub.f32 %v479_v18, %v491_v9  ;;  %v527_v61 = vsub.f32 %v3533_v20, %v3679_v37  ;;  %v2943_v20 = vld [vmem:[#allocation7 + $0x1cc] sm:$0xf] }
  0xdd   : > { %v563_v24 = vmul.f32 0.5, %v562_v21  ;;  %v3693_v25 = vadd.f32 1e-12, %v514_v22  ;;  %v2602_v37 = vld [vmem:[#allocation7 + $0x1e8] sm:$0xf0] }
  0xde   : > { %v515_v29 = vmax.f32 %v503_v23, 0.0  ;;  %v385_v30 = vpop.xlane.xlu0 %384 }
  0xdf   : > { %3105 = vrsqrt.f32 %v3693_v25  ;;  %v3700_v38 = vmul.f32 0.00390625, %v385_v30  ;;  %v564_v43 = vsub.f32 1.5, %v563_v24  ;;  %vm586_vm9 = vweird.f32 %v3693_v25 }
  0xe0   : > { %v3698_v35 = vadd.f32 1e-12, %v515_v29  ;;  %v445_v39 = vpop.xlane.xlu2 %444  ;;  %v3104_v42 = vpop.eup %3103 }
  0xe1   : > { %v481_v44 = vmul.f32 0.00390625, %v445_v39  ;;  %v442_v45 = vpop.xlane.xlu1 %441  ;;  %v571_v48 = vmul.f32 %v3104_v42, %v549_v15  ;;  %v493_v53 = vmul.f32 %v3700_v38, %v3700_v38  ;;  %v565_v57 = vmul.f32 %v3102_v5, %v564_v43 }
  0xe2   : > { %3107 = vrsqrt.f32 %v3698_v35  ;;  %v480_v55 = vmul.f32 0.00390625, %v442_v45  ;;  %vm577_vm3 = vweird.f32 %v3104_v42  ;;  %vm596_vm6 = vweird.f32 %v3698_v35 }
  0xe3   : > { %v572_v54 = vmul.f32 %v3104_v42, %v571_v48  ;;  %v505_v60 = vsub.f32 %v481_v44, %v493_v53  ;;  %v569_v21 = vsel %vm568_vm2, %v3102_v5, %v565_v57  ;;  %vm578_vm5 = vmor %vm576_vm4, %vm577_vm3 }
  0xe4   : > { %v504_v62 = vsub.f32 %v480_v55, %v492_v52  ;;  %v680_v15 = vmul.f32 %v569_v21, %v524_v3  ;;  %v681_v45 = vmul.f32 %v569_v21, %v525_v16 }
  0xe5   : > { %v3707_v1 = vpop.eup %3105  ;;  %v573_v2 = vmul.f32 0.5, %v572_v54  ;;  %v517_v8 = vmax.f32 %v505_v60, 0.0 }
  0xe6   : > { %v581_v6 = vmul.f32 %v3707_v1, %v3693_v25  ;;  %v388_v9 = vpop.xlane.xlu0 %387  ;;  %v516_v18 = vmax.f32 %v504_v62, 0.0  ;;  %vm587_vm8 = vweird.f32 %v3707_v1 }
  0xe7   : > { %v574_v17 = vsub.f32 1.5, %v573_v2  ;;  %v3720_v36 = vadd.f32 1e-12, %v517_v8  ;;  %v3725_v39 = vmul.f32 0.00390625, %v388_v9  ;;  %v2605_v9 = vor.u32 %v2943_v20, %v2602_v37  ;;  %vm588_vm11 = vmor %vm586_vm9, %vm587_vm8 }
  0xe8   : > { %v3714_v14 = vpop.eup %3107  ;;  %v448_v22 = vpop.xlane.xlu2 %447  ;;  %v582_v29 = vmul.f32 %v3707_v1, %v581_v6  ;;  %v3723_v30 = vadd.f32 1e-12, %v516_v18 }
  0xe9   : > { %v591_v4 = vmul.f32 %v3714_v14, %v3698_v35  ;;  %v391_v23 = vpop.xlane.xlu1 %390  ;;  %v575_v24 = vmul.f32 %v3104_v42, %v574_v17  ;;  %3109 = vrsqrt.f32 %v3720_v36  ;;  %v482_v44 = vmul.f32 0.00390625, %v448_v22  ;;  %v2858_v22 = vld [vmem:[#allocation7 + $0x3e8] sm:$0xf0]  ;;  %1736 = vmatpush.bf16.msrb.mxu2 %v2605_v9 }
  0xea   : > { %3111 = vrsqrt.f32 %v3723_v30  ;;  %v583_v54 = vmul.f32 0.5, %v582_v29  ;;  %v494_v19 = vmul.f32 %v3725_v39, %v3725_v39  ;;  %v3736_v55 = vmul.f32 0.00390625, %v391_v23 }
  0xeb   : > { %v592_v5 = vmul.f32 %v3714_v14, %v591_v4  ;;  %v579_v43 = vsel %vm578_vm5, %v3104_v42, %v575_v24  ;;  %v3007_v4 = vld [vmem:[#allocation7 + $0x3cc] sm:$0xf]  ;;  %vm597_vm7 = vweird.f32 %v3714_v14  ;;  %vm616_vm12 = vweird.f32 %v3720_v36 }
  0xec   : > { %v682_v48 = vmul.f32 %v579_v43, %v526_v7  ;;  %v683_v52 = vmul.f32 %v579_v43, %v527_v61  ;;  %v506_v62 = vsub.f32 %v482_v44, %v494_v19  ;;  %v495_v3 = vmul.f32 %v3736_v55, %v3736_v55  ;;  %vm598_vm10 = vmor %vm596_vm6, %vm597_vm7 }
  0xed   : > { %v593_v53 = vmul.f32 0.5, %v592_v5  ;;  %v584_v18 = vsub.f32 1.5, %v583_v54  ;;  %v2861_v44 = vor.u32 %v3007_v4, %v2858_v22  ;;  %v530_v54 = vsub.f32 %v3541_v27, %v3686_v56  ;;  %v3011_v27 = vld [vmem:[#allocation7 + $0x3e4] sm:$0xf0] }
  0xee   : > { %v3738_v57 = vpack.c.bf16 %v682_v48, %v680_v15  ;;  %v3740_v60 = vpack.c.bf16 %v683_v52, %v681_v45  ;;  %v451_v42 = vpop.xlane.xlu0 %450  ;;  %v518_v29 = vmax.f32 %v506_v62, 0.0  ;;  %v2600_v52 = vld [vmem:[#allocation7 + $0x1c8] sm:$0xf]  ;;  %v531_v19 = vsub.f32 %v3543_v28, %v3686_v56 }
  0xef   : > { %v594_v2 = vsub.f32 1.5, %v593_v53  ;;  %v3744_v6 = vpop.eup %3109  ;;  %v483_v8 = vmul.f32 0.00390625, %v451_v42  ;;  %v585_v45 = vmul.f32 %v3707_v1, %v584_v18  ;;  %v2947_v53 = vld [vmem:[#allocation7 + $0x1e4] sm:$0xf0]  ;;  %1775 = vmatpush.bf16.msrb.mxu3 %v2861_v44  ;;  %vm606_vm15 = vweird.f32 %v3723_v30 }
  0xf0   : > { %1510 = vmatmul.bf16.vlgmr.msra.gmra.mxu0 %v3738_v57  ;;  %1549 = vmatmul.bf16.vlgmr.msra.gmra.mxu1 %v3740_v60  ;;  %v3748_v17 = vpop.eup %3111  ;;  %v611_v21 = vmul.f32 %v3744_v6, %v3720_v36  ;;  %v397_v23 = vpop.xlane.xlu2 %396  ;;  %v3772_v20 = vadd.f32 1e-12, %v518_v29  ;;  %v2856_v42 = vld [vmem:[#allocation7 + $0x3c8] sm:$0xf]  ;;  %v2601_v56 = vor.u32 %v2947_v53, %v2600_v52  ;;  %vm617_vm13 = vweird.f32 %v3744_v6  ;;  %v2826_v52 = vld [vmem:[#allocation7 + $0x3a8] sm:$0xf0] }
  0xf1   : > { %v394_v16 = vpop.xlane.xlu1 %393  ;;  %1588 = vmatmul.bf16.vlgmr.msra.gmra.mxu2 %v3738_v57  ;;  %1627 = vmatmul.bf16.vlgmr.msra.gmra.mxu3 %v3740_v60  ;;  %v601_v24 = vmul.f32 %v3748_v17, %v3723_v30  ;;  %v595_v7 = vmul.f32 %v3714_v14, %v594_v2  ;;  %v507_v5 = vsub.f32 %v483_v8, %v495_v3  ;;  %v3777_v8 = vmul.f32 0.00390625, %v397_v23  ;;  %vm3803_vm14 = vmor %vm616_vm12, %vm617_vm13 }
  0xf2   : > { %v612_v61 = vmul.f32 %v3744_v6, %v611_v21  ;;  %v3761_v43 = vmul.f32 0.00390625, %v394_v16  ;;  %v528_v16 = vsub.f32 %v3518_v11, %v3681_v49  ;;  %v589_v18 = vsel %vm588_vm11, %v3707_v1, %v585_v45  ;;  %1658 = vmatpush.bf16.msrb.mxu0 %v2601_v56  ;;  %v2570_v1 = vld [vmem:[#allocation7 + $0x1a8] sm:$0xf0] }
  0xf3   : > { %v602_v15 = vmul.f32 %v3748_v17, %v601_v24  ;;  %v519_v48 = vmax.f32 %v507_v5, 0.0  ;;  %v599_v2 = vsel %vm598_vm10, %v3714_v14, %v595_v7  ;;  %v529_v14 = vsub.f32 %v3520_v12, %v3681_v49  ;;  %v2935_v49 = vld [vmem:[#allocation7 + $0x18c] sm:$0xf] }
  0xf4   : > { %v613_v62 = vmul.f32 0.5, %v612_v61  ;;  %v496_v25 = vmul.f32 %v3761_v43, %v3761_v43  ;;  %v686_v21 = vmul.f32 %v599_v2, %v530_v54  ;;  %v687_v4 = vmul.f32 %v599_v2, %v531_v19  ;;  %v2939_v2 = vld [vmem:[#allocation7 + $0x1a4] sm:$0xf0] }
  0xf5   : > { %v3775_v3 = vadd.f32 1e-12, %v519_v48  ;;  %v603_v28 = vmul.f32 0.5, %v602_v15  ;;  %v2857_v22 = vor.u32 %v3011_v27, %v2856_v42  ;;  %v497_v29 = vmul.f32 %v3777_v8, %v3777_v8  ;;  %v2999_v48 = vld [vmem:[#allocation7 + $0x38c] sm:$0xf] }
  0xf6   : > { %v454_v37 = vpop.xlane.xlu0 %453  ;;  %v614_v23 = vsub.f32 1.5, %v613_v62  ;;  %v684_v61 = vmul.f32 %v589_v18, %v528_v16  ;;  %v685_v5 = vmul.f32 %v589_v18, %v529_v14  ;;  %v2568_v42 = vld [vmem:[#allocation7 + $0x188] sm:$0xf]  ;;  %vm607_vm0 = vweird.f32 %v3748_v17 }
  0xf7   : > { %v484_v35 = vmul.f32 0.00390625, %v454_v37  ;;  %3113 = vrsqrt.f32 %v3775_v3  ;;  %v604_v12 = vsub.f32 1.5, %v603_v28  ;;  %1697 = vmatpush.bf16.msrb.mxu1 %v2857_v22  ;;  %v2573_v37 = vor.u32 %v2935_v49, %v2570_v1  ;;  %v3003_v18 = vld [vmem:[#allocation7 + $0x3a4] sm:$0xf0]  ;;  %vm608_vm1 = vmor %vm606_vm15, %vm607_vm0 }
  0xf8   : > { %3115 = vrsqrt.f32 %v3772_v20  ;;  %v400_v11 = vpop.xlane.xlu2 %399  ;;  %v3794_v15 = vpack.c.bf16 %v686_v21, %v684_v61  ;;  %v3796_v44 = vpack.c.bf16 %v687_v4, %v685_v5  ;;  %v615_v54 = vmul.f32 %v3744_v6, %v614_v23  ;;  %v2927_v21 = vld [vmem:[#allocation7 + $0x14c] sm:$0xf] }
  0xf9   : > { %v457_v9 = vpop.xlane.xlu1 %456  ;;  %v508_v24 = vsub.f32 %v484_v35, %v496_v25  ;;  %v605_v27 = vmul.f32 %v3748_v17, %v604_v12  ;;  %1737 = vmatpush.bf16.msrb.mxu2 %v2573_v37  ;;  %v2829_v25 = vor.u32 %v2999_v48, %v2826_v52  ;;  %v532_v16 = vsub.f32 %v3561_v40, %v3695_v26  ;;  %v2991_v61 = vld [vmem:[#allocation7 + $0x34c] sm:$0xf] }
  0xfa   : > { %v485_v7 = vmul.f32 0.00390625, %v457_v9  ;;  %v2824_v9 = vld [vmem:[#allocation7 + $0x388] sm:$0xf]  ;;  %v2569_v14 = vor.u32 %v2939_v2, %v2568_v42  ;;  %v534_v4 = vsub.f32 %v3575_v50, %v3700_v38  ;;  %v619_v22 = vsel %vm3803_vm14, %v3744_v6, %v615_v54  ;;  %v2794_v5 = vld [vmem:[#allocation7 + $0x368] sm:$0xf0] }
  0xfb   : > { %v520_v19 = vmax.f32 %v508_v24, 0.0  ;;  %v3829_v40 = vmul.f32 0.00390625, %v400_v11  ;;  %1776 = vmatpush.bf16.msrb.mxu3 %v2829_v25  ;;  %v2538_v24 = vld [vmem:[#allocation7 + $0x168] sm:$0xf0]  ;;  %v2825_v6 = vor.u32 %v3003_v18, %v2824_v9  ;;  %v535_v30 = vsub.f32 %v3577_v51, %v3700_v38  ;;  %v2792_v54 = vld [vmem:[#allocation7 + $0x348] sm:$0xf] }
  0xfc   : > { %v509_v45 = vsub.f32 %v485_v7, %v497_v29  ;;  %v609_v29 = vsel %vm608_vm1, %v3748_v17, %v605_v27  ;;  %1659 = vmatpush.bf16.msrb.mxu0 %v2569_v14  ;;  %v2541_v1 = vor.u32 %v2927_v21, %v2538_v24  ;;  %v2931_v17 = vld [vmem:[#allocation7 + $0x164] sm:$0xf0]  ;;  %v533_v48 = vsub.f32 %v3563_v41, %v3695_v26  ;;  %v2919_v37 = vld [vmem:[#allocation7 + $0x10c] sm:$0xf] }
  0xfd   : > { %v3798_v53 = vpop.eup %3113  ;;  %v3827_v23 = vadd.f32 1e-12, %v520_v19  ;;  %1698 = vmatpush.bf16.msrb.mxu1 %v2825_v6  ;;  %v2797_v52 = vor.u32 %v2991_v61, %v2794_v5  ;;  %v2995_v19 = vld [vmem:[#allocation7 + $0x364] sm:$0xf0]  ;;  %v690_v42 = vmul.f32 %v619_v22, %v534_v4  ;;  %v691_v2 = vmul.f32 %v619_v22, %v535_v30  ;;  %v2506_v27 = vld [vmem:[#allocation7 + $0x128] sm:$0xf0] }
  0xfe   : > { %v3801_v62 = vpop.eup %3115  ;;  %v631_v28 = vmul.f32 %v3798_v53, %v3775_v3  ;;  %v521_v56 = vmax.f32 %v509_v45, 0.0  ;;  %v403_v35 = vpop.xlane.xlu0 %402  ;;  %v2536_v45 = vld [vmem:[#allocation7 + $0x148] sm:$0xf]  ;;  %v688_v36 = vmul.f32 %v609_v29, %v532_v16  ;;  %1738 = vmatpush.bf16.msrb.mxu2 %v2541_v1  ;;  %v689_v25 = vmul.f32 %v609_v29, %v533_v48  ;;  %v2911_v61 = vld [vmem:[#allocation7 + $0xcc] sm:$0xf] }
  0xff   : > { %v621_v50 = vmul.f32 %v3801_v62, %v3772_v20  ;;  %v3834_v7 = vmul.f32 0.00390625, %v403_v35  ;;  %v2537_v38 = vor.u32 %v2931_v17, %v2536_v45  ;;  %v498_v41 = vmul.f32 %v3829_v40, %v3829_v40  ;;  %1777 = vmatpush.bf16.msrb.mxu3 %v2797_v52  ;;  %v2504_v26 = vld [vmem:[#allocation7 + $0x108] sm:$0xf]  ;;  %v2474_v5 = vld [vmem:[#allocation7 + $0xe8] sm:$0xf0] }
 0x100   : > { %1515 = vmatmul.bf16.gmra.mxu0 %v3794_v15  ;;  %1554 = vmatmul.bf16.gmra.mxu1 %v3796_v44  ;;  %v632_v12 = vmul.f32 %v3798_v53, %v631_v28  ;;  %v3839_v11 = vadd.f32 1e-12, %v521_v56  ;;  %v463_v49 = vpop.xlane.xlu2 %462  ;;  %v2983_v28 = vld [vmem:[#allocation7 + $0x30c] sm:$0xf]  ;;  %v2923_v14 = vld [vmem:[#allocation7 + $0x124] sm:$0xf0]  ;;  %v2793_v21 = vor.u32 %v2995_v19, %v2792_v54  ;;  %v2509_v4 = vor.u32 %v2919_v37, %v2506_v27 }
 0x101   : > { %1632 = vmatmul.bf16.gmra.mxu3 %v3796_v44  ;;  %1593 = vmatmul.bf16.gmra.mxu2 %v3794_v15  ;;  %v460_v51 = vpop.xlane.xlu1 %459  ;;  %v2762_v56 = vld [vmem:[#allocation7 + $0x328] sm:$0xf0]  ;;  %v622_v35 = vmul.f32 %v3801_v62, %v621_v50  ;;  %v487_v9 = vmul.f32 0.00390625, %v463_v49  ;;  %v499_v16 = vmul.f32 %v3834_v7, %v3834_v7  ;;  %v2505_v29 = vor.u32 %v2923_v14, %v2504_v26  ;;  %v2760_v50 = vld [vmem:[#allocation7 + $0x308] sm:$0xf] }
 0x102   : > { %v633_v18 = vmul.f32 0.5, %v632_v12  ;;  %1660 = vmatpush.bf16.msrb.mxu0 %v2537_v38  ;;  %3117 = vrsqrt.f32 %v3839_v11  ;;  %v486_v22 = vmul.f32 0.00390625, %v460_v51  ;;  %v2765_v24 = vor.u32 %v2983_v28, %v2762_v56  ;;  %v2987_v6 = vld [vmem:[#allocation7 + $0x324] sm:$0xf0]  ;;  %1699 = vmatpush.bf16.msrb.mxu1 %v2793_v21  ;;  %v2975_v30 = vld [vmem:[#allocation7 + $0x2cc] sm:$0xf] }
 0x103   : > { %1739 = vmatpush.bf16.msrb.mxu2 %v2509_v4  ;;  %3119 = vrsqrt.f32 %v3827_v23  ;;  %v2730_v12 = vld [vmem:[#allocation7 + $0x2e8] sm:$0xf0]  ;;  %v2472_v49 = vld [vmem:[#allocation7 + $0xc8] sm:$0xf]  ;;  %v3850_v45 = vpack.c.bf16 %v690_v42, %v688_v36  ;;  %v623_v17 = vmul.f32 0.5, %v622_v35  ;;  %v511_v48 = vsub.f32 %v487_v9, %v499_v16 }
 0x104   : > { %1778 = vmatpush.bf16.msrb.mxu3 %v2765_v24  ;;  %v2915_v1 = vld [vmem:[#allocation7 + $0xe4] sm:$0xf0]  ;;  %v3852_v52 = vpack.c.bf16 %v691_v2, %v689_v25  ;;  %v634_v54 = vsub.f32 1.5, %v633_v18  ;;  %v510_v19 = vsub.f32 %v486_v22, %v498_v41  ;;  %v2761_v37 = vor.u32 %v2987_v6, %v2760_v50  ;;  %v2967_v26 = vld [vmem:[#allocation7 + $0x28c] sm:$0xf] }
 0x105   : > { %v2728_v51 = vld [vmem:[#allocation7 + $0x2c8] sm:$0xf]  ;;  %v2477_v27 = vor.u32 %v2911_v61, %v2474_v5  ;;  %v2733_v28 = vor.u32 %v2975_v30, %v2730_v12  ;;  %v2473_v56 = vor.u32 %v2915_v1, %v2472_v49  ;;  %v2698_v14 = vld [vmem:[#allocation7 + $0x2a8] sm:$0xf0]  ;;  %vm636_vm2 = vweird.f32 %v3775_v3 }
 0x106   : > { %1661 = vmatpush.bf16.msrb.mxu0 %v2505_v29  ;;  %v2979_v38 = vld [vmem:[#allocation7 + $0x2e4] sm:$0xf0]  ;;  %vm637_vm3 = vweird.f32 %v3798_v53  ;;  %v2903_v42 = vld [vmem:[#allocation7 + $0x8c] sm:$0xf]  ;;  %v624_v36 = vsub.f32 1.5, %v623_v17  ;;  %v523_v25 = vmax.f32 %v511_v48, 0.0  ;;  %1700 = vmatpush.bf16.msrb.mxu1 %v2761_v37  ;;  %vm626_vm4 = vweird.f32 %v3772_v20 }
 0x107   : > { %v2442_v2 = vld [vmem:[#allocation7 + $0xa8] sm:$0xf0]  ;;  %v2729_v35 = vor.u32 %v2979_v38, %v2728_v51  ;;  %v635_v41 = vmul.f32 %v3798_v53, %v634_v54  ;;  %v522_v18 = vmax.f32 %v510_v19, 0.0  ;;  %v2701_v16 = vor.u32 %v2967_v26, %v2698_v14  ;;  %v2440_v4 = vld [vmem:[#allocation7 + $0x88] sm:$0xf]  ;;  %vm3871_vm6 = vmor %vm636_vm2, %vm637_vm3  ;;  %1740 = vmatpush.bf16.msrb.mxu2 %v2477_v27 }
 0x108   : > { %v3854_v21 = vpop.eup %3117  ;;  %1779 = vmatpush.bf16.msrb.mxu3 %v2733_v28  ;;  %v2907_v22 = vld [vmem:[#allocation7 + $0xa4] sm:$0xf0]  ;;  %vm627_vm5 = vweird.f32 %v3801_v62  ;;  %v2445_v50 = vor.u32 %v2903_v42, %v2442_v2  ;;  %v2895_v30 = vld [vmem:[#allocation7 + $0x4c] sm:$0xf]  ;;  %v625_v1 = vmul.f32 %v3801_v62, %v624_v36  ;;  %v3880_v17 = vadd.f32 1e-12, %v523_v25 }
 0x109   : > { %v3861_v9 = vpop.eup %3119  ;;  %v651_v29 = vmul.f32 %v3854_v21, %v3839_v11  ;;  %v2441_v6 = vor.u32 %v2907_v22, %v2440_v4  ;;  %v2696_v61 = vld [vmem:[#allocation7 + $0x288] sm:$0xf]  ;;  %v2410_v12 = vld [vmem:[#allocation7 + $0x68] sm:$0xf0]  ;;  %vm628_vm7 = vmor %vm626_vm4, %vm627_vm5  ;;  %v639_v37 = vsel %vm3871_vm6, %v3798_v53, %v635_v41  ;;  %v3889_v51 = vadd.f32 1e-12, %v522_v18 }
 0x10a   : > { %1662 = vmatpush.bf16.msrb.mxu0 %v2473_v56  ;;  %v2971_v5 = vld [vmem:[#allocation7 + $0x2a4] sm:$0xf0]  ;;  %v2959_v49 = vld [vmem:[#allocation7 + $0x24c] sm:$0xf]  ;;  %v641_v3 = vmul.f32 %v3861_v9, %v3827_v23  ;;  %1701 = vmatpush.bf16.msrb.mxu1 %v2729_v35  ;;  %v2413_v56 = vor.u32 %v2895_v30, %v2410_v12  ;;  %v538_v14 = vsub.f32 %v3605_v10, %v3736_v55  ;;  %3121 = vrsqrt.f32 %v3880_v17  ;;  %v2948_v4 = vld [vmem:[#allocation7 + $0x1ec] sm:$0xf0] }
 0x10b   : > { %v2697_v48 = vor.u32 %v2971_v5, %v2696_v61  ;;  %v2666_v54 = vld [vmem:[#allocation7 + $0x268] sm:$0xf0]  ;;  %v2408_v19 = vld [vmem:[#allocation7 + $0x48] sm:$0xf]  ;;  %v652_v28 = vmul.f32 %v3854_v21, %v651_v29  ;;  %1741 = vmatpush.bf16.msrb.mxu2 %v2445_v50  ;;  %v539_v20 = vsub.f32 %v3607_v13, %v3736_v55  ;;  %v536_v53 = vsub.f32 %v3593_v63, %v3725_v39 }
 0x10c   : > { %1780 = vmatpush.bf16.msrb.mxu3 %v2701_v16  ;;  %v2669_v38 = vor.u32 %v2959_v49, %v2666_v54  ;;  %v2899_v27 = vld [vmem:[#allocation7 + $0x64] sm:$0xf0]  ;;  %v629_v42 = vsel %vm628_vm7, %v3801_v62, %v625_v1  ;;  %v642_v2 = vmul.f32 %v3861_v9, %v641_v3  ;;  %v537_v36 = vsub.f32 %v3595_v0, %v3725_v39  ;;  %v2887_v24 = vld [vmem:[#allocation7 + $0xc] sm:$0xf] }
 0x10d   : > { %v2409_v26 = vor.u32 %v2899_v27, %v2408_v19  ;;  %v694_v25 = vmul.f32 %v639_v37, %v538_v14  ;;  %v695_v35 = vmul.f32 %v639_v37, %v539_v20  ;;  %3123 = vrsqrt.f32 %v3889_v51  ;;  %v2963_v22 = vld [vmem:[#allocation7 + $0x264] sm:$0xf0]  ;;  %v2378_v5 = vld [vmem:[#allocation7 + $0x28] sm:$0xf0] }
 0x10e   : > { %1663 = vmatpush.bf16.msrb.mxu0 %v2441_v6  ;;  %1702 = vmatpush.bf16.msrb.mxu1 %v2697_v48  ;;  %v653_v10 = vmul.f32 0.5, %v652_v28  ;;  %v692_v13 = vmul.f32 %v629_v42, %v536_v53  ;;  %v693_v63 = vmul.f32 %v629_v42, %v537_v36  ;;  %v643_v55 = vmul.f32 0.5, %v642_v2  ;;  %v2951_v30 = vld [vmem:[#allocation7 + $0x20c] sm:$0xf]  ;;  %v2376_v3 = vld [vmem:[#allocation7 + $0x8] sm:$0xf] }
 0x10f   : > { %1742 = vmatpush.bf16.msrb.mxu2 %v2413_v56  ;;  %vm656_vm8 = vweird.f32 %v3839_v11  ;;  %vm657_vm9 = vweird.f32 %v3854_v21  ;;  %vm646_vm11 = vweird.f32 %v3827_v23  ;;  %vm647_vm12 = vweird.f32 %v3861_v9  ;;  %v2664_v11 = vld [vmem:[#allocation7 + $0x248] sm:$0xf]  ;;  %v2634_v12 = vld [vmem:[#allocation7 + $0x228] sm:$0xf0] }
 0x110   : > { %1520 = vmatmul.bf16.gmra.mxu0 %v3850_v45  ;;  %1559 = vmatmul.bf16.gmra.mxu1 %v3852_v52  ;;  %v3904_v62 = vpack.c.bf16 %v694_v25, %v692_v13  ;;  %v3906_v41 = vpack.c.bf16 %v695_v35, %v693_v63  ;;  %v3910_v0 = vpop.eup %3121  ;;  %v654_v39 = vsub.f32 1.5, %v653_v10  ;;  %v644_v16 = vsub.f32 1.5, %v643_v55  ;;  %vm3916_vm10 = vmor %vm656_vm8, %vm657_vm9  ;;  %v2891_v48 = vld [vmem:[#allocation7 + $0x24] sm:$0xf0]  ;;  %v2610_v35 = vld [vmem:[#allocation7 + $0x1f0] sm:$0xf0] }
 0x111   : > { %1637 = vmatmul.bf16.gmra.mxu3 %v3852_v52  ;;  %1598 = vmatmul.bf16.gmra.mxu2 %v3850_v45  ;;  %v671_v50 = vmul.f32 %v3910_v0, %v3880_v17  ;;  %v2665_v61 = vor.u32 %v2963_v22, %v2664_v11  ;;  %v2381_v49 = vor.u32 %v2887_v24, %v2378_v5  ;;  %v2632_v54 = vld [vmem:[#allocation7 + $0x208] sm:$0xf]  ;;  %vm648_vm13 = vmor %vm646_vm11, %vm647_vm12  ;;  %vm676_vm14 = vweird.f32 %v3880_v17  ;;  %v3008_v10 = vld [vmem:[#allocation7 + $0x3d4] sm:$0xf] }
 0x112   : > { %1781 = vmatpush.bf16.msrb.mxu3 %v2669_v38  ;;  %1664 = vmatpush.bf16.msrb.mxu0 %v2409_v26  ;;  %v655_v29 = vmul.f32 %v3854_v21, %v654_v39  ;;  %v2637_v1 = vor.u32 %v2951_v30, %v2634_v12  ;;  %v645_v19 = vmul.f32 %v3861_v9, %v644_v16  ;;  %v2955_v38 = vld [vmem:[#allocation7 + $0x224] sm:$0xf0]  ;;  %vm677_vm15 = vweird.f32 %v3910_v0  ;;  %v2866_v39 = vld [vmem:[#allocation7 + $0x3f0] sm:$0xf0]  ;;  %v2608_v16 = vld [vmem:[#allocation7 + $0x1d0] sm:$0xf] }
 0x113   : > { %v3912_v18 = vpop.eup %3123  ;;  %1703 = vmatpush.bf16.msrb.mxu1 %v2665_v61  ;;  %v2377_v37 = vor.u32 %v2891_v48, %v2376_v3  ;;  %v542_v27 = vsub.f32 %v3625_v31, %v3777_v8  ;;  %v543_v28 = vsub.f32 %v3627_v32, %v3777_v8  ;;  %1743 = vmatpush.bf16.msrb.mxu2 %v2381_v49  ;;  %vm666_vm0 = vweird.f32 %v3889_v51  ;;  %vm3956_vm2 = vmor %vm676_vm14, %vm677_vm15  ;;  %v2864_v24 = vld [vmem:[#allocation7 + $0x3d0] sm:$0xf]  ;;  %v2578_v12 = vld [vmem:[#allocation7 + $0x1b0] sm:$0xf0] }
 0x114   : > { %v661_v6 = vmul.f32 %v3912_v18, %v3889_v51  ;;  %v2633_v56 = vor.u32 %v2955_v38, %v2632_v54  ;;  %v659_v26 = vsel %vm3916_vm10, %v3854_v21, %v655_v29  ;;  %v672_v14 = vmul.f32 %v3910_v0, %v671_v50  ;;  %v2944_v51 = vld [vmem:[#allocation7 + $0x1d4] sm:$0xf]  ;;  %v3012_v29 = vld [vmem:[#allocation7 + $0x3ec] sm:$0xf0] }
 0x115   : > { %v649_v31 = vsel %vm648_vm13, %v3861_v9, %v645_v19  ;;  %v540_v32 = vsub.f32 %v3629_v33, %v3761_v43  ;;  %v541_v8 = vsub.f32 %v3631_v34, %v3761_v43  ;;  %v698_v23 = vmul.f32 %v659_v26, %v542_v27  ;;  %v2936_v50 = vld [vmem:[#allocation7 + $0x194] sm:$0xf]  ;;  %v2832_v38 = vld [vmem:[#allocation7 + $0x390] sm:$0xf] }
 0x116   : > { %1782 = vmatpush.bf16.msrb.mxu3 %v2637_v1  ;;  %v662_v20 = vmul.f32 %v3912_v18, %v661_v6  ;;  %1665 = vmatpush.bf16.msrb.mxu0 %v2377_v37  ;;  %v699_v53 = vmul.f32 %v659_v26, %v543_v28  ;;  %v673_v42 = vmul.f32 0.5, %v672_v14  ;;  %vm667_vm1 = vweird.f32 %v3912_v18  ;;  %v3000_v49 = vld [vmem:[#allocation7 + $0x394] sm:$0xf]  ;;  %v3004_v28 = vld [vmem:[#allocation7 + $0x3ac] sm:$0xf0] }
 0x117   : > { %1704 = vmatpush.bf16.msrb.mxu1 %v2633_v56  ;;  %v696_v36 = vmul.f32 %v649_v31, %v540_v32  ;;  %v697_v21 = vmul.f32 %v649_v31, %v541_v8  ;;  %vm3962_vm3 = vmor %vm666_vm0, %vm667_vm1  ;;  %v2613_v55 = vor.u32 %v2944_v51, %v2610_v35  ;;  %v2869_v11 = vor.u32 %v3008_v10, %v2866_v39  ;;  %v2834_v1 = vld [vmem:[#allocation7 + $0x3b0] sm:$0xf0]  ;;  %v2512_v35 = vld [vmem:[#allocation7 + $0x110] sm:$0xf] }
 0x118   : > { %v663_v2 = vmul.f32 0.5, %v662_v20  ;;  %v674_v33 = vsub.f32 1.5, %v673_v42  ;;  %v2609_v22 = vor.u32 %v2948_v4, %v2608_v16  ;;  %v544_v6 = vsub.f32 %v3645_v46, %v3829_v40  ;;  %v2928_v56 = vld [vmem:[#allocation7 + $0x154] sm:$0xf]  ;;  %v2800_v42 = vld [vmem:[#allocation7 + $0x350] sm:$0xf] }
 0x119   : > { %v3950_v25 = vpack.c.bf16 %v698_v23, %v696_v36  ;;  %v3952_v9 = vpack.c.bf16 %v699_v53, %v697_v21  ;;  %v545_v61 = vsub.f32 %v3647_v47, %v3829_v40  ;;  %v546_v5 = vsub.f32 %v3659_v58, %v3834_v7  ;;  %1892 = vmatpush.bf16.msra.mxu2 %v2613_v55  ;;  %v2546_v26 = vld [vmem:[#allocation7 + $0x170] sm:$0xf0]  ;;  %v2544_v23 = vld [vmem:[#allocation7 + $0x150] sm:$0xf] }
 0x11a   : > { %v664_v34 = vsub.f32 1.5, %v663_v2  ;;  %v675_v13 = vmul.f32 %v3910_v0, %v674_v33  ;;  %v2865_v30 = vor.u32 %v3012_v29, %v2864_v24  ;;  %v547_v3 = vsub.f32 %v3661_v59, %v3834_v7  ;;  %1931 = vmatpush.bf16.msra.mxu3 %v2869_v11  ;;  %1814 = vmatpush.bf16.msra.mxu0 %v2609_v22  ;;  %v2992_v31 = vld [vmem:[#allocation7 + $0x354] sm:$0xf]  ;;  %v2932_v53 = vld [vmem:[#allocation7 + $0x16c] sm:$0xf0] }
 0x11b   : > { %v2581_v48 = vor.u32 %v2936_v50, %v2578_v12  ;;  %v2837_v54 = vor.u32 %v3000_v49, %v2834_v1  ;;  %v2833_v14 = vor.u32 %v3004_v28, %v2832_v38  ;;  %v2549_v20 = vor.u32 %v2928_v56, %v2546_v26  ;;  %v2802_v32 = vld [vmem:[#allocation7 + $0x370] sm:$0xf0]  ;;  %v2996_v36 = vld [vmem:[#allocation7 + $0x36c] sm:$0xf0] }
 0x11c   : > { %v665_v63 = vmul.f32 %v3912_v18, %v664_v34  ;;  %v679_v46 = vsel %vm3956_vm2, %v3910_v0, %v675_v13  ;;  %1853 = vmatpush.bf16.msra.mxu1 %v2865_v30  ;;  %v2576_v0 = vld [vmem:[#allocation7 + $0x190] sm:$0xf]  ;;  %v2805_v8 = vor.u32 %v2992_v31, %v2802_v32  ;;  %v2545_v2 = vor.u32 %v2932_v53, %v2544_v23  ;;  %v2920_v33 = vld [vmem:[#allocation7 + $0x114] sm:$0xf] }
 0x11d   : > { %1893 = vmatpush.bf16.msra.mxu2 %v2581_v48  ;;  %v702_v58 = vmul.f32 %v679_v46, %v546_v5  ;;  %v703_v40 = vmul.f32 %v679_v46, %v547_v3  ;;  %v2801_v21 = vor.u32 %v2996_v36, %v2800_v42  ;;  %v2514_v34 = vld [vmem:[#allocation7 + $0x130] sm:$0xf0]  ;;  %v2924_v13 = vld [vmem:[#allocation7 + $0x12c] sm:$0xf0] }
 0x11e   : > { %v669_v47 = vsel %vm3962_vm3, %v3912_v18, %v665_v63  ;;  %1932 = vmatpush.bf16.msra.mxu3 %v2837_v54  ;;  %v2940_v18 = vld [vmem:[#allocation7 + $0x1ac] sm:$0xf0]  ;;  %v2517_v43 = vor.u32 %v2920_v33, %v2514_v34  ;;  %v2984_v17 = vld [vmem:[#allocation7 + $0x314] sm:$0xf]  ;;  %v2513_v63 = vor.u32 %v2924_v13, %v2512_v35 }
 0x11f   : > { %v700_v19 = vmul.f32 %v669_v47, %v544_v6  ;;  %v701_v37 = vmul.f32 %v669_v47, %v545_v61  ;;  %v2577_v27 = vor.u32 %v2940_v18, %v2576_v0  ;;  %v2770_v51 = vld [vmem:[#allocation7 + $0x330] sm:$0xf0]  ;;  %v2768_v55 = vld [vmem:[#allocation7 + $0x310] sm:$0xf]  ;;  %v4000_v6 = vld [vmem:[#allocation8] sm:$0xff] }
 0x120   : > { %1525 = vmatmul.bf16.gmra.mxu0 %v3904_v62  ;;  %1564 = vmatmul.bf16.gmra.mxu1 %v3906_v41  ;;  %v2773_v10 = vor.u32 %v2984_v17, %v2770_v51  ;;  %v2988_v39 = vld [vmem:[#allocation7 + $0x32c] sm:$0xf0]  ;;  %v2912_v4 = vld [vmem:[#allocation7 + $0xd4] sm:$0xf]  ;;  %v4003_v61 = vperm.slane %v4000_v6, 0 }
 0x121   : > { %1642 = vmatmul.bf16.gmra.mxu3 %v3906_v41  ;;  %1603 = vmatmul.bf16.gmra.mxu2 %v3904_v62  ;;  %v3984_v59 = vpack.c.bf16 %v702_v58, %v700_v19  ;;  %v3986_v7 = vpack.c.bf16 %v703_v40, %v701_v37  ;;  %v2769_v16 = vor.u32 %v2988_v39, %v2768_v55  ;;  %v2482_v11 = vld [vmem:[#allocation7 + $0xf0] sm:$0xf0]  ;;  %v2480_v5 = vld [vmem:[#allocation7 + $0xd0] sm:$0xf]  ;;  %v4011_v58 = vperm.slane %v4000_v6, 1 }
 0x122   : > { %1815 = vmatpush.bf16.msra.mxu0 %v2577_v27  ;;  %1854 = vmatpush.bf16.msra.mxu1 %v2833_v14  ;;  %v2976_v22 = vld [vmem:[#allocation7 + $0x2d4] sm:$0xf]  ;;  %v2485_v24 = vor.u32 %v2912_v4, %v2482_v11  ;;  %v2916_v30 = vld [vmem:[#allocation7 + $0xec] sm:$0xf0] }
 0x123   : > { %1894 = vmatpush.bf16.msra.mxu2 %v2549_v20  ;;  %1933 = vmatpush.bf16.msra.mxu3 %v2805_v8  ;;  %v2738_v29 = vld [vmem:[#allocation7 + $0x2f0] sm:$0xf0]  ;;  %v2736_v12 = vld [vmem:[#allocation7 + $0x2d0] sm:$0xf]  ;;  %v2481_v49 = vor.u32 %v2916_v30, %v2480_v5 }
 0x124   : > { %v2741_v50 = vor.u32 %v2976_v22, %v2738_v29  ;;  %v2980_v1 = vld [vmem:[#allocation7 + $0x2ec] sm:$0xf0]  ;;  %v2904_v40 = vld [vmem:[#allocation7 + $0x94] sm:$0xf] }
 0x125   : > { %v2737_v54 = vor.u32 %v2980_v1, %v2736_v12  ;;  %v2450_v19 = vld [vmem:[#allocation7 + $0xb0] sm:$0xf0]  ;;  %v2448_v38 = vld [vmem:[#allocation7 + $0x90] sm:$0xf] }
 0x126   : > { %1816 = vmatpush.bf16.msra.mxu0 %v2545_v2  ;;  %1855 = vmatpush.bf16.msra.mxu1 %v2801_v21  ;;  %v2453_v37 = vor.u32 %v2904_v40, %v2450_v19  ;;  %v2968_v0 = vld [vmem:[#allocation7 + $0x294] sm:$0xf]  ;;  %v2908_v26 = vld [vmem:[#allocation7 + $0xac] sm:$0xf0] }
 0x127   : > { %1895 = vmatpush.bf16.msra.mxu2 %v2517_v43  ;;  %1934 = vmatpush.bf16.msra.mxu3 %v2773_v10  ;;  %v2706_v18 = vld [vmem:[#allocation7 + $0x2b0] sm:$0xf0]  ;;  %v2449_v32 = vor.u32 %v2908_v26, %v2448_v38  ;;  %v2704_v42 = vld [vmem:[#allocation7 + $0x290] sm:$0xf] }
 0x128   : > { %v2709_v56 = vor.u32 %v2968_v0, %v2706_v18  ;;  %v2972_v2 = vld [vmem:[#allocation7 + $0x2ac] sm:$0xf0]  ;;  %v2896_v21 = vld [vmem:[#allocation7 + $0x54] sm:$0xf] }
 0x129   : > { %v2705_v36 = vor.u32 %v2972_v2, %v2704_v42  ;;  %v2418_v33 = vld [vmem:[#allocation7 + $0x70] sm:$0xf0]  ;;  %v2416_v11 = vld [vmem:[#allocation7 + $0x50] sm:$0xf] }
 0x12a   : > { %1817 = vmatpush.bf16.msra.mxu0 %v2513_v63  ;;  %1856 = vmatpush.bf16.msra.mxu1 %v2769_v16  ;;  %v2960_v34 = vld [vmem:[#allocation7 + $0x254] sm:$0xf]  ;;  %v2421_v51 = vor.u32 %v2896_v21, %v2418_v33  ;;  %v2900_v22 = vld [vmem:[#allocation7 + $0x6c] sm:$0xf0]  ;;  %v2618_v21 = vld [vmem:[#allocation7 + $0x1f8] sm:$0xf0] }
 0x12b   : > { %1896 = vmatpush.bf16.msra.mxu2 %v2485_v24  ;;  %1935 = vmatpush.bf16.msra.mxu3 %v2741_v50  ;;  %v2674_v35 = vld [vmem:[#allocation7 + $0x270] sm:$0xf0]  ;;  %v2672_v24 = vld [vmem:[#allocation7 + $0x250] sm:$0xf]  ;;  %v2417_v50 = vor.u32 %v2900_v22, %v2416_v11  ;;  %v2949_v11 = vld [vmem:[#allocation7 + $0x1f4] sm:$0xf0] }
 0x12c   : > { %v2677_v55 = vor.u32 %v2960_v34, %v2674_v35  ;;  %v2964_v5 = vld [vmem:[#allocation7 + $0x26c] sm:$0xf0]  ;;  %v2386_v40 = vld [vmem:[#allocation7 + $0x30] sm:$0xf0] }
 0x12d   : > { %v2642_v0 = vld [vmem:[#allocation7 + $0x230] sm:$0xf0] }
 0x12e   : > { %1818 = vmatpush.bf16.msra.mxu0 %v2481_v49  ;;  %1857 = vmatpush.bf16.msra.mxu1 %v2737_v54  ;;  %v2673_v49 = vor.u32 %v2964_v5, %v2672_v24 }
 0x12f   : > { %1897 = vmatpush.bf16.msra.mxu2 %v2453_v37  ;;  %1936 = vmatpush.bf16.msra.mxu3 %v2709_v56  ;;  %v2952_v37 = vld [vmem:[#allocation7 + $0x214] sm:$0xf] }
 0x130   : > { %1530 = vmatmul.bf16.gmra.mxu0 %v3950_v25  ;;  %1569 = vmatmul.bf16.gmra.mxu1 %v3952_v9  ;;  %v2645_v38 = vor.u32 %v2952_v37, %v2642_v0  ;;  %v2842_v37 = vld [vmem:[#allocation7 + $0x3b8] sm:$0xf0] }
 0x131   : > { %1647 = vmatmul.bf16.gmra.mxu3 %v3952_v9  ;;  %1608 = vmatmul.bf16.gmra.mxu2 %v3950_v25 }
 0x132   : > { %1819 = vmatpush.bf16.msra.mxu0 %v2449_v32  ;;  %1858 = vmatpush.bf16.msra.mxu1 %v2705_v36  ;;  %v2945_v36 = vld [vmem:[#allocation7 + $0x1dc] sm:$0xf] }
 0x133   : > { %1898 = vmatpush.bf16.msra.mxu2 %v2421_v51  ;;  %1937 = vmatpush.bf16.msra.mxu3 %v2677_v55  ;;  %v2621_v34 = vor.u32 %v2945_v36, %v2618_v21  ;;  %v2554_v36 = vld [vmem:[#allocation7 + $0x178] sm:$0xf0] }
 0x136   : > { %1820 = vmatpush.bf16.msra.mxu0 %v2417_v50  ;;  %1859 = vmatpush.bf16.msra.mxu1 %v2673_v49  ;;  %v3013_v50 = vld [vmem:[#allocation7 + $0x3f4] sm:$0xf0] }
 0x137   : > { %1938 = vmatpush.bf16.msra.mxu3 %v2645_v38  ;;  %v2584_v38 = vld [vmem:[#allocation7 + $0x198] sm:$0xf] }
 0x140   : > { %1535 = vmatmul.bf16.gmra.mxu0 %v3984_v59  ;;  %1574 = vmatmul.bf16.gmra.mxu1 %v3986_v7 }
 0x141   : > { %1652 = vmatmul.bf16.gmra.mxu3 %v3986_v7  ;;  %1613 = vmatmul.bf16.gmra.mxu2 %v3984_v59 }
 0x150   : > { %1666 = vmatmul.bf16.vlgmr.msrb.gmra.mxu0 %v3738_v57  ;;  %1705 = vmatmul.bf16.vlgmr.msrb.gmra.mxu1 %v3740_v60 }
 0x151   : > { %1783 = vmatmul.bf16.vlgmr.msrb.gmra.mxu3 %v3740_v60  ;;  %1744 = vmatmul.bf16.vlgmr.msrb.gmra.mxu2 %v3738_v57 }
 0x160   : > { %1671 = vmatmul.bf16.gmra.mxu0 %v3794_v15  ;;  %1710 = vmatmul.bf16.gmra.mxu1 %v3796_v44 }
 0x161   : > { %1788 = vmatmul.bf16.gmra.mxu3 %v3796_v44  ;;  %1749 = vmatmul.bf16.gmra.mxu2 %v3794_v15 }
 0x16d   : > { %v1511_v3 = vpop.f32.mrf.mxu0  ;;  %v1550_v48 = vpop.f32.mrf.mxu1 }
 0x16e   : > { %v1512_v46 = vadd.f32 %v1511_v3, %v4003_v61 }
 0x170   : > { %v1551_v47 = vadd.f32 %v1550_v48, %v1512_v46  ;;  %1676 = vmatmul.bf16.gmra.mxu0 %v3850_v45  ;;  %1715 = vmatmul.bf16.gmra.mxu1 %v3852_v52 }
 0x171   : > { %1793 = vmatmul.bf16.gmra.mxu3 %v3852_v52  ;;  %1754 = vmatmul.bf16.gmra.mxu2 %v3850_v45 }
 0x172   : > { %2126 = vst [vmem:[%s4013_s20] sm:$0xff] %v1551_v47  ;;  %v2888_v47 = vld [vmem:[#allocation7 + $0x14] sm:$0xf] }
 0x173   : > { %v2389_v19 = vor.u32 %v2888_v47, %v2386_v40  ;;  %v2586_v47 = vld [vmem:[#allocation7 + $0x1b8] sm:$0xf0] }
 0x174   : > { %v1589_v27 = vpop.f32.mrf.mxu2  ;;  %v1628_v28 = vpop.f32.mrf.mxu3 }
 0x175   : > { %v1590_v14 = vadd.f32 %v1589_v27, %v4011_v58  ;;  %v1513_v20 = vpop.f32.mrf.mxu0  ;;  %v1552_v31 = vpop.f32.mrf.mxu1  ;;  %v2384_v27 = vld [vmem:[#allocation7 + $0x10] sm:$0xf]  ;;  %1899 = vmatpush.bf16.msra.mxu2 %v2389_v19  ;;  %v3001_v19 = vld [vmem:[#allocation7 + $0x39c] sm:$0xf] }
 0x176   : > { %v1514_v8 = vadd.f32 %v1513_v20, %v4003_v61 }
 0x177   : > { %v1629_v23 = vadd.f32 %v1628_v28, %v1590_v14  ;;  %v2892_v28 = vld [vmem:[#allocation7 + $0x2c] sm:$0xf0] }
 0x178   : > { %v1553_v53 = vadd.f32 %v1552_v31, %v1514_v8  ;;  %v2385_v14 = vor.u32 %v2892_v28, %v2384_v27  ;;  %v2640_v8 = vld [vmem:[#allocation7 + $0x210] sm:$0xf]  ;;  %v2941_v27 = vld [vmem:[#allocation7 + $0x1b4] sm:$0xf0] }
 0x179   : > { %2127 = vst [vmem:[%s4013_s20 + $0x8] sm:$0xff] %v1629_v23  ;;  %v2956_v23 = vld [vmem:[#allocation7 + $0x22c] sm:$0xf0]  ;;  %2048 = vmatpush.bf16.msrb.mxu2 %v2621_v34  ;;  %v2993_v34 = vld [vmem:[#allocation7 + $0x35c] sm:$0xf] }
 0x17a   : > { %2134 = vst [vmem:[%s4013_s20 + $0x40] sm:$0xff] %v1553_v53  ;;  %1821 = vmatpush.bf16.msra.mxu0 %v2385_v14  ;;  %v2641_v53 = vor.u32 %v2956_v23, %v2640_v8  ;;  %v2840_v23 = vld [vmem:[#allocation7 + $0x398] sm:$0xf] }
 0x17c   : > { %v1591_v43 = vpop.f32.mrf.mxu2  ;;  %v1630_v17 = vpop.f32.mrf.mxu3  ;;  %1860 = vmatpush.bf16.msra.mxu1 %v2641_v53  ;;  %v3005_v53 = vld [vmem:[#allocation7 + $0x3b4] sm:$0xf0] }
 0x17d   : > { %v1592_v10 = vadd.f32 %v1591_v43, %v4011_v58  ;;  %v1516_v13 = vpop.f32.mrf.mxu0  ;;  %v1555_v63 = vpop.f32.mrf.mxu1  ;;  %v3009_v43 = vld [vmem:[#allocation7 + $0x3dc] sm:$0xf] }
 0x17e   : > { %v1517_v39 = vadd.f32 %v1516_v13, %v4003_v61 }
 0x17f   : > { %v1631_v16 = vadd.f32 %v1630_v17, %v1592_v10  ;;  %v2874_v17 = vld [vmem:[#allocation7 + $0x3f8] sm:$0xf0] }
 0x180   : > { %v1556_v4 = vadd.f32 %v1555_v63, %v1517_v39  ;;  %1681 = vmatmul.bf16.gmra.mxu0 %v3904_v62  ;;  %1720 = vmatmul.bf16.gmra.mxu1 %v3906_v41  ;;  %v2877_v10 = vor.u32 %v3009_v43, %v2874_v17  ;;  %v2810_v43 = vld [vmem:[#allocation7 + $0x378] sm:$0xf0] }
 0x181   : > { %2135 = vst [vmem:[%s4013_s20 + $0x48] sm:$0xff] %v1631_v16  ;;  %1798 = vmatmul.bf16.gmra.mxu3 %v3906_v41  ;;  %1759 = vmatmul.bf16.gmra.mxu2 %v3904_v62 }
 0x182   : > { %2142 = vst [vmem:[%s4013_s20 + $0x80] sm:$0xff] %v1556_v4  ;;  %2087 = vmatpush.bf16.msrb.mxu3 %v2877_v10  ;;  %v2616_v4 = vld [vmem:[#allocation7 + $0x1d8] sm:$0xf] }
 0x183   : > { %v2617_v24 = vor.u32 %v2949_v11, %v2616_v4  ;;  %v2933_v4 = vld [vmem:[#allocation7 + $0x174] sm:$0xf0] }
 0x184   : > { %v1633_v29 = vpop.f32.mrf.mxu3  ;;  %v1594_v30 = vpop.f32.mrf.mxu2 }
 0x185   : > { %v1518_v12 = vpop.f32.mrf.mxu0  ;;  %v1595_v1 = vadd.f32 %v1594_v30, %v4011_v58  ;;  %v1557_v48 = vpop.f32.mrf.mxu1  ;;  %1970 = vmatpush.bf16.msrb.mxu0 %v2617_v24  ;;  %v2808_v24 = vld [vmem:[#allocation7 + $0x358] sm:$0xf] }
 0x186   : > { %v1519_v3 = vadd.f32 %v1518_v12, %v4003_v61 }
 0x187   : > { %v1634_v54 = vadd.f32 %v1633_v29, %v1595_v1  ;;  %v2872_v29 = vld [vmem:[#allocation7 + $0x3d8] sm:$0xf] }
 0x188   : > { %v1558_v46 = vadd.f32 %v1557_v48, %v1519_v3  ;;  %v2873_v12 = vor.u32 %v3013_v50, %v2872_v29  ;;  %v2997_v29 = vld [vmem:[#allocation7 + $0x374] sm:$0xf0] }
 0x189   : > { %2143 = vst [vmem:[%s4013_s20 + $0x88] sm:$0xff] %v1634_v54 }
 0x18a   : > { %2150 = vst [vmem:[%s4013_s20 + $0xc0] sm:$0xff] %v1558_v46  ;;  %2009 = vmatpush.bf16.msrb.mxu1 %v2873_v12  ;;  %v2937_v46 = vld [vmem:[#allocation7 + $0x19c] sm:$0xf] }
 0x18b   : > { %v2589_v40 = vor.u32 %v2937_v46, %v2586_v47  ;;  %v2522_v46 = vld [vmem:[#allocation7 + $0x138] sm:$0xf0] }
 0x18c   : > { %v1635_v18 = vpop.f32.mrf.mxu3  ;;  %v1596_v56 = vpop.f32.mrf.mxu2 }
 0x18d   : > { %v1521_v26 = vpop.f32.mrf.mxu0  ;;  %v1597_v20 = vadd.f32 %v1596_v56, %v4011_v58  ;;  %v1560_v32 = vpop.f32.mrf.mxu1  ;;  %2049 = vmatpush.bf16.msrb.mxu2 %v2589_v40  ;;  %v2985_v40 = vld [vmem:[#allocation7 + $0x31c] sm:$0xf] }
 0x18e   : > { %v1522_v31 = vadd.f32 %v1521_v26, %v4003_v61  ;;  %v2585_v26 = vor.u32 %v2941_v27, %v2584_v38  ;;  %v2925_v38 = vld [vmem:[#allocation7 + $0x134] sm:$0xf0] }
 0x18f   : > { %v1636_v42 = vadd.f32 %v1635_v18, %v1597_v20  ;;  %v2845_v18 = vor.u32 %v3001_v19, %v2842_v37  ;;  %v2778_v19 = vld [vmem:[#allocation7 + $0x338] sm:$0xf0] }
 0x190   : > { %v1561_v2 = vadd.f32 %v1560_v32, %v1522_v31  ;;  %1686 = vmatmul.bf16.gmra.mxu0 %v3950_v25  ;;  %1725 = vmatmul.bf16.gmra.mxu1 %v3952_v9 }
 0x191   : > { %1803 = vmatmul.bf16.gmra.mxu3 %v3952_v9  ;;  %2151 = vst [vmem:[%s4013_s20 + $0xc8] sm:$0xff] %v1636_v42  ;;  %1764 = vmatmul.bf16.gmra.mxu2 %v3950_v25  ;;  %v2841_v42 = vor.u32 %v3005_v53, %v2840_v23  ;;  %v2989_v23 = vld [vmem:[#allocation7 + $0x334] sm:$0xf0] }
 0x192   : > { %2158 = vst [vmem:[%s4013_s20 + $0x100] sm:$0xff] %v1561_v2  ;;  %2088 = vmatpush.bf16.msrb.mxu3 %v2845_v18  ;;  %1971 = vmatpush.bf16.msrb.mxu0 %v2585_v26  ;;  %v2929_v2 = vld [vmem:[#allocation7 + $0x15c] sm:$0xf]  ;;  %v2520_v18 = vld [vmem:[#allocation7 + $0x118] sm:$0xf] }
 0x193   : > { %2010 = vmatpush.bf16.msrb.mxu1 %v2841_v42  ;;  %v2913_v42 = vld [vmem:[#allocation7 + $0xdc] sm:$0xf] }
 0x194   : > { %v1638_v33 = vpop.f32.mrf.mxu3  ;;  %v1599_v51 = vpop.f32.mrf.mxu2 }
 0x195   : > { %v1523_v35 = vpop.f32.mrf.mxu0  ;;  %v1600_v13 = vadd.f32 %v1599_v51, %v4011_v58  ;;  %v1562_v55 = vpop.f32.mrf.mxu1 }
 0x196   : > { %v1524_v63 = vadd.f32 %v1523_v35, %v4003_v61  ;;  %v2813_v35 = vor.u32 %v2993_v34, %v2810_v43  ;;  %v2746_v34 = vld [vmem:[#allocation7 + $0x2f8] sm:$0xf0] }
 0x197   : > { %v1639_v39 = vadd.f32 %v1638_v33, %v1600_v13  ;;  %v2557_v33 = vor.u32 %v2929_v2, %v2554_v36  ;;  %v2490_v2 = vld [vmem:[#allocation7 + $0xf8] sm:$0xf0] }
 0x198   : > { %v1563_v16 = vadd.f32 %v1562_v55, %v1524_v63  ;;  %2089 = vmatpush.bf16.msrb.mxu3 %v2813_v35 }
 0x199   : > { %2159 = vst [vmem:[%s4013_s20 + $0x108] sm:$0xff] %v1639_v39  ;;  %2050 = vmatpush.bf16.msrb.mxu2 %v2557_v33  ;;  %v2977_v33 = vld [vmem:[#allocation7 + $0x2dc] sm:$0xf] }
 0x19a   : > { %2166 = vst [vmem:[%s4013_s20 + $0x140] sm:$0xff] %v1563_v16  ;;  %v2552_v16 = vld [vmem:[#allocation7 + $0x158] sm:$0xf] }
 0x19c   : > { %v1640_v22 = vpop.f32.mrf.mxu3  ;;  %v1601_v5 = vpop.f32.mrf.mxu2 }
 0x19d   : > { %v1526_v30 = vpop.f32.mrf.mxu0  ;;  %v1602_v49 = vadd.f32 %v1601_v5, %v4011_v58  ;;  %v1565_v3 = vpop.f32.mrf.mxu1 }
 0x19e   : > { %v1527_v1 = vadd.f32 %v1526_v30, %v4003_v61  ;;  %v2809_v30 = vor.u32 %v2997_v29, %v2808_v24  ;;  %v2744_v24 = vld [vmem:[#allocation7 + $0x2d8] sm:$0xf] }
 0x19f   : > { %v1641_v48 = vadd.f32 %v1640_v22, %v1602_v49  ;;  %v2553_v22 = vor.u32 %v2933_v4, %v2552_v16  ;;  %v2488_v16 = vld [vmem:[#allocation7 + $0xd8] sm:$0xf] }
 0x1a0   : > { %v1566_v54 = vadd.f32 %v1565_v3, %v1527_v1  ;;  %1691 = vmatmul.bf16.gmra.mxu0 %v3984_v59  ;;  %1730 = vmatmul.bf16.gmra.mxu1 %v3986_v7  ;;  %v2917_v4 = vld [vmem:[#allocation7 + $0xf4] sm:$0xf0] }
 0x1a1   : > { %1808 = vmatmul.bf16.gmra.mxu3 %v3986_v7  ;;  %2167 = vst [vmem:[%s4013_s20 + $0x148] sm:$0xff] %v1641_v48  ;;  %1769 = vmatmul.bf16.gmra.mxu2 %v3984_v59  ;;  %v2981_v29 = vld [vmem:[#allocation7 + $0x2f4] sm:$0xf0] }
 0x1a2   : > { %2174 = vst [vmem:[%s4013_s20 + $0x180] sm:$0xff] %v1566_v54  ;;  %1972 = vmatpush.bf16.msrb.mxu0 %v2553_v22  ;;  %2011 = vmatpush.bf16.msrb.mxu1 %v2809_v30  ;;  %v2921_v54 = vld [vmem:[#allocation7 + $0x11c] sm:$0xf]  ;;  %v2489_v22 = vor.u32 %v2917_v4, %v2488_v16  ;;  %v2901_v16 = vld [vmem:[#allocation7 + $0x74] sm:$0xf0] }
 0x1a3   : > { %v2525_v47 = vor.u32 %v2921_v54, %v2522_v46  ;;  %v2458_v54 = vld [vmem:[#allocation7 + $0xb8] sm:$0xf0] }
 0x1a4   : > { %v1643_v0 = vpop.f32.mrf.mxu3  ;;  %v1604_v28 = vpop.f32.mrf.mxu2 }
 0x1a5   : > { %v1528_v56 = vpop.f32.mrf.mxu0  ;;  %v1605_v14 = vadd.f32 %v1604_v28, %v4011_v58  ;;  %v1567_v31 = vpop.f32.mrf.mxu1  ;;  %2051 = vmatpush.bf16.msrb.mxu2 %v2525_v47  ;;  %v2969_v47 = vld [vmem:[#allocation7 + $0x29c] sm:$0xf] }
 0x1a6   : > { %v1529_v20 = vadd.f32 %v1528_v56, %v4003_v61  ;;  %v2521_v56 = vor.u32 %v2925_v38, %v2520_v18  ;;  %v2909_v18 = vld [vmem:[#allocation7 + $0xb4] sm:$0xf0] }
 0x1a7   : > { %v1644_v32 = vadd.f32 %v1643_v0, %v1605_v14  ;;  %v2781_v0 = vor.u32 %v2985_v40, %v2778_v19  ;;  %v2714_v40 = vld [vmem:[#allocation7 + $0x2b8] sm:$0xf0] }
 0x1a8   : > { %v1568_v8 = vadd.f32 %v1567_v31, %v1529_v20  ;;  %1973 = vmatpush.bf16.msrb.mxu0 %v2521_v56 }
 0x1a9   : > { %2175 = vst [vmem:[%s4013_s20 + $0x188] sm:$0xff] %v1644_v32  ;;  %2090 = vmatpush.bf16.msrb.mxu3 %v2781_v0  ;;  %v2456_v0 = vld [vmem:[#allocation7 + $0x98] sm:$0xf] }
 0x1aa   : > { %2182 = vst [vmem:[%s4013_s20 + $0x1c0] sm:$0xff] %v1568_v8  ;;  %v2776_v8 = vld [vmem:[#allocation7 + $0x318] sm:$0xf] }
 0x1ab   : > { %v2777_v53 = vor.u32 %v2989_v23, %v2776_v8  ;;  %v2973_v8 = vld [vmem:[#allocation7 + $0x2b4] sm:$0xf0] }
 0x1ac   : > { %v1645_v21 = vpop.f32.mrf.mxu3  ;;  %v1606_v17 = vpop.f32.mrf.mxu2  ;;  %1974 = vmatpush.bf16.msrb.mxu0 %v2489_v22  ;;  %v2680_v22 = vld [vmem:[#allocation7 + $0x258] sm:$0xf] }
 0x1ad   : > { %v1531_v51 = vpop.f32.mrf.mxu0  ;;  %v1607_v10 = vadd.f32 %v1606_v17, %v4011_v58  ;;  %v1570_v63 = vpop.f32.mrf.mxu1  ;;  %2012 = vmatpush.bf16.msrb.mxu1 %v2777_v53  ;;  %v2897_v53 = vld [vmem:[#allocation7 + $0x5c] sm:$0xf] }
 0x1ae   : > { %v1532_v13 = vadd.f32 %v1531_v51, %v4003_v61  ;;  %v2749_v51 = vor.u32 %v2977_v33, %v2746_v34  ;;  %v2682_v33 = vld [vmem:[#allocation7 + $0x278] sm:$0xf0] }
 0x1af   : > { %v1646_v55 = vadd.f32 %v1645_v21, %v1607_v10  ;;  %v2493_v21 = vor.u32 %v2913_v42, %v2490_v2  ;;  %v2426_v42 = vld [vmem:[#allocation7 + $0x78] sm:$0xf0] }
 0x1b0   : > { %v1571_v39 = vadd.f32 %v1570_v63, %v1532_v13  ;;  %1822 = vmatmul.bf16.vlgmr.msra.gmra.mxu0 %v3738_v57  ;;  %1861 = vmatmul.bf16.vlgmr.msra.gmra.mxu1 %v3740_v60 }
 0x1b1   : > { %1939 = vmatmul.bf16.vlgmr.msra.gmra.mxu3 %v3740_v60  ;;  %2183 = vst [vmem:[%s4013_s20 + $0x1c8] sm:$0xff] %v1646_v55  ;;  %1900 = vmatmul.bf16.vlgmr.msra.gmra.mxu2 %v3738_v57 }
 0x1b2   : > { %2190 = vst [vmem:[%s4013_s20 + $0x200] sm:$0xff] %v1571_v39  ;;  %2052 = vmatpush.bf16.msrb.mxu2 %v2493_v21  ;;  %2091 = vmatpush.bf16.msrb.mxu3 %v2749_v51  ;;  %v4081_v39 = vperm.slane %v4000_v6, 2  ;;  %v2961_v21 = vld [vmem:[#allocation7 + $0x25c] sm:$0xf] }
 0x1b4   : > { %v1648_v11 = vpop.f32.mrf.mxu3  ;;  %v1609_v50 = vpop.f32.mrf.mxu2 }
 0x1b5   : > { %v1533_v5 = vpop.f32.mrf.mxu0  ;;  %v1610_v12 = vadd.f32 %v1609_v50, %v4011_v58  ;;  %v1572_v1 = vpop.f32.mrf.mxu1 }
 0x1b6   : > { %v1534_v49 = vadd.f32 %v1533_v5, %v4003_v61 }
 0x1b7   : > { %v1649_v3 = vadd.f32 %v1648_v11, %v1610_v12 }
 0x1b8   : > { %v1573_v48 = vadd.f32 %v1572_v1, %v1534_v49 }
 0x1b9   : > { %2191 = vst [vmem:[%s4013_s20 + $0x208] sm:$0xff] %v1649_v3 }
 0x1ba   : > { %2198 = vst [vmem:[%s4013_s20 + $0x240] sm:$0xff] %v1573_v48  ;;  %v4092_v48 = vperm.slane %v4000_v6, 3 }
 0x1bc   : > { %v1650_v37 = vpop.f32.mrf.mxu3  ;;  %v1611_v27 = vpop.f32.mrf.mxu2 }
 0x1bd   : > { %v1536_v28 = vpop.f32.mrf.mxu0  ;;  %v1612_v26 = vadd.f32 %v1611_v27, %v4011_v58  ;;  %v1575_v20 = vpop.f32.mrf.mxu1 }
 0x1be   : > { %v1537_v14 = vadd.f32 %v1536_v28, %v4003_v61  ;;  %v2457_v28 = vor.u32 %v2909_v18, %v2456_v0  ;;  %v2893_v0 = vld [vmem:[#allocation7 + $0x34] sm:$0xf0] }
 0x1bf   : > { %v1651_v31 = vadd.f32 %v1650_v37, %v1612_v26  ;;  %v2717_v37 = vor.u32 %v2969_v47, %v2714_v40  ;;  %v2650_v47 = vld [vmem:[#allocation7 + $0x238] sm:$0xf0] }
 0x1c0   : > { %v1576_v32 = vadd.f32 %v1575_v20, %v1537_v14  ;;  %1827 = vmatmul.bf16.gmra.mxu0 %v3794_v15  ;;  %1866 = vmatmul.bf16.gmra.mxu1 %v3796_v44 }
 0x1c1   : > { %1944 = vmatmul.bf16.gmra.mxu3 %v3796_v44  ;;  %2199 = vst [vmem:[%s4013_s20 + $0x248] sm:$0xff] %v1651_v31  ;;  %1905 = vmatmul.bf16.gmra.mxu2 %v3794_v15 }
 0x1c2   : > { %2206 = vst [vmem:[%s4013_s20 + $0x280] sm:$0xff] %v1576_v32  ;;  %2092 = vmatpush.bf16.msrb.mxu3 %v2717_v37  ;;  %1975 = vmatpush.bf16.msrb.mxu0 %v2457_v28  ;;  %v2712_v32 = vld [vmem:[#allocation7 + $0x298] sm:$0xf] }
 0x1c3   : > { %v2713_v23 = vor.u32 %v2973_v8, %v2712_v32  ;;  %v2392_v37 = vld [vmem:[#allocation7 + $0x18] sm:$0xf] }
 0x1c4   : > { %v1653_v36 = vpop.f32.mrf.mxu3  ;;  %v1614_v43 = vpop.f32.mrf.mxu2 }
 0x1c5   : > { %v1538_v17 = vpop.f32.mrf.mxu0  ;;  %v1615_v35 = vadd.f32 %v1614_v43, %v4011_v58  ;;  %v1577_v13 = vpop.f32.mrf.mxu1 }
 0x1c6   : > { %v1539_v10 = vadd.f32 %v1538_v17, %v4003_v61  ;;  %v2745_v61 = vor.u32 %v2981_v29, %v2744_v24  ;;  %v2685_v17 = vor.u32 %v2961_v21, %v2682_v33  ;;  %v2965_v24 = vld [vmem:[#allocation7 + $0x274] sm:$0xf0] }
 0x1c7   : > { %v1654_v63 = vadd.f32 %v1653_v36, %v1615_v35  ;;  %v2429_v36 = vor.u32 %v2897_v53, %v2426_v42 }
 0x1c8   : > { %v1578_v55 = vadd.f32 %v1577_v13, %v1539_v10  ;;  %2013 = vmatpush.bf16.msrb.mxu1 %v2745_v61  ;;  %2093 = vmatpush.bf16.msrb.mxu3 %v2685_v17 }
 0x1c9   : > { %2207 = vst [vmem:[%s4013_s20 + $0x288] sm:$0xff] %v1654_v63 }
 0x1ca   : > { %2214 = vst [vmem:[%s4013_s20 + $0x2c0] sm:$0xff] %v1578_v55  ;;  %v2424_v55 = vld [vmem:[#allocation7 + $0x58] sm:$0xf] }
 0x1cc   : > { %v1655_v11 = vpop.f32.mrf.mxu3  ;;  %v1616_v50 = vpop.f32.mrf.mxu2  ;;  %2014 = vmatpush.bf16.msrb.mxu1 %v2713_v23 }
 0x1cd   : > { %v1667_v5 = vpop.f32.mrf.mxu0  ;;  %v1617_v30 = vadd.f32 %v1616_v50, %v4011_v58  ;;  %v1706_v49 = vpop.f32.mrf.mxu1  ;;  %v2905_v58 = vld [vmem:[#allocation7 + $0x9c] sm:$0xf] }
 0x1ce   : > { %v1668_v12 = vadd.f32 %v1667_v5, %v4081_v39  ;;  %v2461_v46 = vor.u32 %v2905_v58, %v2458_v54  ;;  %v2681_v5 = vor.u32 %v2965_v24, %v2680_v22  ;;  %v2394_v58 = vld [vmem:[#allocation7 + $0x38] sm:$0xf0] }
 0x1cf   : > { %v1656_v1 = vadd.f32 %v1655_v11, %v1617_v30  ;;  %v2425_v11 = vor.u32 %v2901_v16, %v2424_v55 }
 0x1d0   : > { %v1707_v3 = vadd.f32 %v1706_v49, %v1668_v12  ;;  %1832 = vmatmul.bf16.gmra.mxu0 %v3850_v45  ;;  %1871 = vmatmul.bf16.gmra.mxu1 %v3852_v52 }
 0x1d1   : > { %1949 = vmatmul.bf16.gmra.mxu3 %v3852_v52  ;;  %2215 = vst [vmem:[%s4013_s20 + $0x2c8] sm:$0xff] %v1656_v1  ;;  %1910 = vmatmul.bf16.gmra.mxu2 %v3850_v45 }
 0x1d2   : > { %2128 = vst [vmem:[%s4013_s20 + $0x10] sm:$0xff] %v1707_v3  ;;  %2053 = vmatpush.bf16.msrb.mxu2 %v2461_v46  ;;  %1976 = vmatpush.bf16.msrb.mxu0 %v2425_v11  ;;  %v2889_v3 = vld [vmem:[#allocation7 + $0x1c] sm:$0xf] }
 0x1d3   : > { %2015 = vmatpush.bf16.msrb.mxu1 %v2681_v5  ;;  %v2397_v54 = vor.u32 %v2889_v3, %v2394_v58  ;;  %v2953_v46 = vld [vmem:[#allocation7 + $0x21c] sm:$0xf] }
 0x1d4   : > { %v1784_v19 = vpop.f32.mrf.mxu3  ;;  %v1745_v38 = vpop.f32.mrf.mxu2 }
 0x1d5   : > { %v1669_v27 = vpop.f32.mrf.mxu0  ;;  %v1746_v56 = vadd.f32 %v1745_v38, %v4092_v48  ;;  %v1708_v14 = vpop.f32.mrf.mxu1 }
 0x1d6   : > { %v1670_v26 = vadd.f32 %v1669_v27, %v4081_v39  ;;  %2054 = vmatpush.bf16.msrb.mxu2 %v2429_v36  ;;  %v2393_v27 = vor.u32 %v2893_v0, %v2392_v37 }
 0x1d7   : > { %v1785_v20 = vadd.f32 %v1784_v19, %v1746_v56  ;;  %v2653_v19 = vor.u32 %v2953_v46, %v2650_v47 }
 0x1d8   : > { %v1709_v31 = vadd.f32 %v1708_v14, %v1670_v26  ;;  %v2648_v14 = vld [vmem:[#allocation7 + $0x218] sm:$0xf]  ;;  %1977 = vmatpush.bf16.msrb.mxu0 %v2393_v27 }
 0x1d9   : > { %2129 = vst [vmem:[%s4013_s20 + $0x18] sm:$0xff] %v1785_v20  ;;  %2094 = vmatpush.bf16.msrb.mxu3 %v2653_v19  ;;  %v2957_v20 = vld [vmem:[#allocation7 + $0x234] sm:$0xf0] }
 0x1da   : > { %2136 = vst [vmem:[%s4013_s20 + $0x50] sm:$0xff] %v1709_v31  ;;  %2055 = vmatpush.bf16.msrb.mxu2 %v2397_v54  ;;  %v2649_v31 = vor.u32 %v2957_v20, %v2648_v14 }
 0x1dc   : > { %v1786_v2 = vpop.f32.mrf.mxu3  ;;  %v1747_v34 = vpop.f32.mrf.mxu2  ;;  %2016 = vmatpush.bf16.msrb.mxu1 %v2649_v31 }
 0x1dd   : > { %v1672_v43 = vpop.f32.mrf.mxu0  ;;  %v1748_v51 = vadd.f32 %v1747_v34, %v4092_v48  ;;  %v1711_v10 = vpop.f32.mrf.mxu1 }
 0x1de   : > { %v1673_v35 = vadd.f32 %v1672_v43, %v4081_v39 }
 0x1df   : > { %v1787_v13 = vadd.f32 %v1786_v2, %v1748_v51 }
 0x1e0   : > { %v1712_v63 = vadd.f32 %v1711_v10, %v1673_v35  ;;  %1837 = vmatmul.bf16.gmra.mxu0 %v3904_v62  ;;  %1876 = vmatmul.bf16.gmra.mxu1 %v3906_v41 }
 0x1e1   : > { %1954 = vmatmul.bf16.gmra.mxu3 %v3906_v41  ;;  %2137 = vst [vmem:[%s4013_s20 + $0x58] sm:$0xff] %v1787_v13  ;;  %1915 = vmatmul.bf16.gmra.mxu2 %v3904_v62 }
 0x1e2   : > { %2144 = vst [vmem:[%s4013_s20 + $0x90] sm:$0xff] %v1712_v63 }
 0x1e4   : > { %v1789_v4 = vpop.f32.mrf.mxu3  ;;  %v1750_v29 = vpop.f32.mrf.mxu2 }
 0x1e5   : > { %v1674_v50 = vpop.f32.mrf.mxu0  ;;  %v1751_v61 = vadd.f32 %v1750_v29, %v4092_v48  ;;  %v1713_v12 = vpop.f32.mrf.mxu1 }
 0x1e6   : > { %v1675_v30 = vadd.f32 %v1674_v50, %v4081_v39 }
 0x1e7   : > { %v1790_v49 = vadd.f32 %v1789_v4, %v1751_v61 }
 0x1e8   : > { %v1714_v1 = vadd.f32 %v1713_v12, %v1675_v30 }
 0x1e9   : > { %2145 = vst [vmem:[%s4013_s20 + $0x98] sm:$0xff] %v1790_v49 }
 0x1ea   : > { %2152 = vst [vmem:[%s4013_s20 + $0xd0] sm:$0xff] %v1714_v1 }
 0x1ec   : > { %v1791_v40 = vpop.f32.mrf.mxu3  ;;  %v1752_v18 = vpop.f32.mrf.mxu2 }
 0x1ed   : > { %v1677_v38 = vpop.f32.mrf.mxu0  ;;  %v1753_v28 = vadd.f32 %v1752_v18, %v4092_v48  ;;  %v1716_v26 = vpop.f32.mrf.mxu1 }
 0x1ee   : > { %v1678_v56 = vadd.f32 %v1677_v38, %v4081_v39 }
 0x1ef   : > { %v1792_v32 = vadd.f32 %v1791_v40, %v1753_v28 }
 0x1f0   : > { %v1717_v8 = vadd.f32 %v1716_v26, %v1678_v56  ;;  %1842 = vmatmul.bf16.gmra.mxu0 %v3950_v25  ;;  %1881 = vmatmul.bf16.gmra.mxu1 %v3952_v9 }
 0x1f1   : > { %1959 = vmatmul.bf16.gmra.mxu3 %v3952_v9  ;;  %2153 = vst [vmem:[%s4013_s20 + $0xd8] sm:$0xff] %v1792_v32  ;;  %1920 = vmatmul.bf16.gmra.mxu2 %v3950_v25 }
 0x1f2   : > { %2160 = vst [vmem:[%s4013_s20 + $0x110] sm:$0xff] %v1717_v8 }
 0x1f4   : > { %v1794_v23 = vpop.f32.mrf.mxu3  ;;  %v1755_v53 = vpop.f32.mrf.mxu2 }
 0x1f5   : > { %v1679_v42 = vpop.f32.mrf.mxu0  ;;  %v1756_v2 = vadd.f32 %v1755_v53, %v4092_v48  ;;  %v1718_v21 = vpop.f32.mrf.mxu1 }
 0x1f6   : > { %v1680_v36 = vadd.f32 %v1679_v42, %v4081_v39 }
 0x1f7   : > { %v1795_v33 = vadd.f32 %v1794_v23, %v1756_v2 }
 0x1f8   : > { %v1719_v34 = vadd.f32 %v1718_v21, %v1680_v36  ;;  %v4159_v21 = vperm.slane %v4000_v6, 4 }
 0x1f9   : > { %2161 = vst [vmem:[%s4013_s20 + $0x118] sm:$0xff] %v1795_v33 }
 0x1fa   : > { %2168 = vst [vmem:[%s4013_s20 + $0x150] sm:$0xff] %v1719_v34 }
 0x1fc   : > { %v1796_v43 = vpop.f32.mrf.mxu3  ;;  %v1757_v17 = vpop.f32.mrf.mxu2 }
 0x1fd   : > { %v1682_v51 = vpop.f32.mrf.mxu0  ;;  %v1758_v35 = vadd.f32 %v1757_v17, %v4092_v48  ;;  %v1721_v13 = vpop.f32.mrf.mxu1 }
 0x1fe   : > { %v1683_v10 = vadd.f32 %v1682_v51, %v4081_v39 }
 0x1ff   : > { %v1797_v63 = vadd.f32 %v1796_v43, %v1758_v35  ;;  %v4170_v35 = vperm.slane %v4000_v6, 5 }
 0x200   : > { %v1722_v55 = vadd.f32 %v1721_v13, %v1683_v10  ;;  %1847 = vmatmul.bf16.gmra.mxu0 %v3984_v59  ;;  %1886 = vmatmul.bf16.gmra.mxu1 %v3986_v7 }
 0x201   : > { %1964 = vmatmul.bf16.gmra.mxu3 %v3986_v7  ;;  %2169 = vst [vmem:[%s4013_s20 + $0x158] sm:$0xff] %v1797_v63  ;;  %1925 = vmatmul.bf16.gmra.mxu2 %v3984_v59 }
 0x202   : > { %2176 = vst [vmem:[%s4013_s20 + $0x190] sm:$0xff] %v1722_v55 }
 0x204   : > { %v1799_v16 = vpop.f32.mrf.mxu3  ;;  %v1760_v4 = vpop.f32.mrf.mxu2 }
 0x205   : > { %v1684_v11 = vpop.f32.mrf.mxu0  ;;  %v1761_v22 = vadd.f32 %v1760_v4, %v4092_v48  ;;  %v1723_v29 = vpop.f32.mrf.mxu1 }
 0x206   : > { %v1685_v24 = vadd.f32 %v1684_v11, %v4081_v39 }
 0x207   : > { %v1800_v50 = vadd.f32 %v1799_v16, %v1761_v22 }
 0x208   : > { %v1724_v5 = vadd.f32 %v1723_v29, %v1685_v24 }
 0x209   : > { %2177 = vst [vmem:[%s4013_s20 + $0x198] sm:$0xff] %v1800_v50 }
 0x20a   : > { %2184 = vst [vmem:[%s4013_s20 + $0x1d0] sm:$0xff] %v1724_v5 }
 0x20c   : > { %v1801_v61 = vpop.f32.mrf.mxu3  ;;  %v1762_v30 = vpop.f32.mrf.mxu2 }
 0x20d   : > { %v1687_v12 = vpop.f32.mrf.mxu0  ;;  %v1763_v49 = vadd.f32 %v1762_v30, %v4092_v48  ;;  %v1726_v3 = vpop.f32.mrf.mxu1 }
 0x20e   : > { %v1688_v1 = vadd.f32 %v1687_v12, %v4081_v39 }
 0x20f   : > { %v1802_v58 = vadd.f32 %v1801_v61, %v1763_v49 }
 0x210   : > { %v1727_v54 = vadd.f32 %v1726_v3, %v1688_v1  ;;  %1978 = vmatmul.bf16.vlgmr.msrb.gmra.mxu0 %v3738_v57  ;;  %2017 = vmatmul.bf16.vlgmr.msrb.gmra.mxu1 %v3740_v60 }
 0x211   : > { %2095 = vmatmul.bf16.vlgmr.msrb.gmra.mxu3 %v3740_v60  ;;  %2185 = vst [vmem:[%s4013_s20 + $0x1d8] sm:$0xff] %v1802_v58  ;;  %2056 = vmatmul.bf16.vlgmr.msrb.gmra.mxu2 %v3738_v57 }
 0x212   : > { %2192 = vst [vmem:[%s4013_s20 + $0x210] sm:$0xff] %v1727_v54 }
 0x214   : > { %v1804_v46 = vpop.f32.mrf.mxu3  ;;  %v1765_v47 = vpop.f32.mrf.mxu2 }
 0x215   : > { %v1689_v40 = vpop.f32.mrf.mxu0  ;;  %v1766_v19 = vadd.f32 %v1765_v47, %v4092_v48  ;;  %v1728_v0 = vpop.f32.mrf.mxu1 }
 0x216   : > { %v1690_v37 = vadd.f32 %v1689_v40, %v4081_v39 }
 0x217   : > { %v1805_v18 = vadd.f32 %v1804_v46, %v1766_v19 }
 0x218   : > { %v1729_v38 = vadd.f32 %v1728_v0, %v1690_v37 }
 0x219   : > { %2193 = vst [vmem:[%s4013_s20 + $0x218] sm:$0xff] %v1805_v18 }
 0x21a   : > { %2200 = vst [vmem:[%s4013_s20 + $0x250] sm:$0xff] %v1729_v38 }
 0x21c   : > { %v1806_v27 = vpop.f32.mrf.mxu3  ;;  %v1767_v60 = vpop.f32.mrf.mxu2 }
 0x21d   : > { %v1692_v28 = vpop.f32.mrf.mxu0  ;;  %v1768_v57 = vadd.f32 %v1767_v60, %v4092_v48  ;;  %v1731_v26 = vpop.f32.mrf.mxu1 }
 0x21e   : > { %v1693_v56 = vadd.f32 %v1692_v28, %v4081_v39 }
 0x21f   : > { %v1807_v14 = vadd.f32 %v1806_v27, %v1768_v57 }
 0x220   : > { %v1732_v20 = vadd.f32 %v1731_v26, %v1693_v56  ;;  %1983 = vmatmul.bf16.gmra.mxu0 %v3794_v15  ;;  %2022 = vmatmul.bf16.gmra.mxu1 %v3796_v44 }
 0x221   : > { %2100 = vmatmul.bf16.gmra.mxu3 %v3796_v44  ;;  %2201 = vst [vmem:[%s4013_s20 + $0x258] sm:$0xff] %v1807_v14  ;;  %2061 = vmatmul.bf16.gmra.mxu2 %v3794_v15 }
 0x222   : > { %2208 = vst [vmem:[%s4013_s20 + $0x290] sm:$0xff] %v1732_v20 }
 0x224   : > { %v1809_v31 = vpop.f32.mrf.mxu3  ;;  %v1770_v32 = vpop.f32.mrf.mxu2 }
 0x225   : > { %v1694_v8 = vpop.f32.mrf.mxu0  ;;  %v1771_v23 = vadd.f32 %v1770_v32, %v4092_v48  ;;  %v1733_v42 = vpop.f32.mrf.mxu1 }
 0x226   : > { %v1695_v53 = vadd.f32 %v1694_v8, %v4081_v39 }
 0x227   : > { %v1810_v2 = vadd.f32 %v1809_v31, %v1771_v23 }
 0x228   : > { %v1734_v36 = vadd.f32 %v1733_v42, %v1695_v53 }
 0x229   : > { %2209 = vst [vmem:[%s4013_s20 + $0x298] sm:$0xff] %v1810_v2 }
 0x22a   : > { %2216 = vst [vmem:[%s4013_s20 + $0x2d0] sm:$0xff] %v1734_v36 }
 0x22c   : > { %v1811_v44 = vpop.f32.mrf.mxu3  ;;  %v1772_v15 = vpop.f32.mrf.mxu2 }
 0x22d   : > { %v1823_v33 = vpop.f32.mrf.mxu0  ;;  %v1773_v34 = vadd.f32 %v1772_v15, %v4092_v48  ;;  %v1862_v17 = vpop.f32.mrf.mxu1 }
 0x22e   : > { %v1824_v43 = vadd.f32 %v1823_v33, %v4159_v21 }
 0x22f   : > { %v1812_v51 = vadd.f32 %v1811_v44, %v1773_v34 }
 0x230   : > { %v1863_v39 = vadd.f32 %v1862_v17, %v1824_v43  ;;  %1988 = vmatmul.bf16.gmra.mxu0 %v3850_v45  ;;  %2027 = vmatmul.bf16.gmra.mxu1 %v3852_v52 }
 0x231   : > { %2105 = vmatmul.bf16.gmra.mxu3 %v3852_v52  ;;  %2217 = vst [vmem:[%s4013_s20 + $0x2d8] sm:$0xff] %v1812_v51  ;;  %2066 = vmatmul.bf16.gmra.mxu2 %v3850_v45 }
 0x232   : > { %2130 = vst [vmem:[%s4013_s20 + $0x20] sm:$0xff] %v1863_v39 }
 0x234   : > { %v1940_v48 = vpop.f32.mrf.mxu3  ;;  %v1901_v10 = vpop.f32.mrf.mxu2 }
 0x235   : > { %v1825_v13 = vpop.f32.mrf.mxu0  ;;  %v1902_v63 = vadd.f32 %v1901_v10, %v4170_v35  ;;  %v1864_v16 = vpop.f32.mrf.mxu1 }
 0x236   : > { %v1826_v55 = vadd.f32 %v1825_v13, %v4159_v21 }
 0x237   : > { %v1941_v4 = vadd.f32 %v1940_v48, %v1902_v63 }
 0x238   : > { %v1865_v11 = vadd.f32 %v1864_v16, %v1826_v55 }
 0x239   : > { %2131 = vst [vmem:[%s4013_s20 + $0x28] sm:$0xff] %v1941_v4 }
 0x23a   : > { %2138 = vst [vmem:[%s4013_s20 + $0x60] sm:$0xff] %v1865_v11 }
 0x23c   : > { %v1942_v52 = vpop.f32.mrf.mxu3  ;;  %v1903_v45 = vpop.f32.mrf.mxu2 }
 0x23d   : > { %v1828_v22 = vpop.f32.mrf.mxu0  ;;  %v1904_v6 = vadd.f32 %v1903_v45, %v4170_v35  ;;  %v1867_v29 = vpop.f32.mrf.mxu1 }
 0x23e   : > { %v1829_v24 = vadd.f32 %v1828_v22, %v4159_v21 }
 0x23f   : > { %v1943_v50 = vadd.f32 %v1942_v52, %v1904_v6 }
 0x240   : > { %v1868_v5 = vadd.f32 %v1867_v29, %v1829_v24  ;;  %1993 = vmatmul.bf16.gmra.mxu0 %v3904_v62  ;;  %2032 = vmatmul.bf16.gmra.mxu1 %v3906_v41 }
 0x241   : > { %2110 = vmatmul.bf16.gmra.mxu3 %v3906_v41  ;;  %2139 = vst [vmem:[%s4013_s20 + $0x68] sm:$0xff] %v1943_v50  ;;  %2071 = vmatmul.bf16.gmra.mxu2 %v3904_v62 }
 0x242   : > { %2146 = vst [vmem:[%s4013_s20 + $0xa0] sm:$0xff] %v1868_v5 }
 0x244   : > { %v1945_v61 = vpop.f32.mrf.mxu3  ;;  %v1906_v30 = vpop.f32.mrf.mxu2 }
 0x245   : > { %v1830_v12 = vpop.f32.mrf.mxu0  ;;  %v1907_v49 = vadd.f32 %v1906_v30, %v4170_v35  ;;  %v1869_v3 = vpop.f32.mrf.mxu1 }
 0x246   : > { %v1831_v1 = vadd.f32 %v1830_v12, %v4159_v21 }
 0x247   : > { %v1946_v58 = vadd.f32 %v1945_v61, %v1907_v49 }
 0x248   : > { %v1870_v54 = vadd.f32 %v1869_v3, %v1831_v1 }
 0x249   : > { %2147 = vst [vmem:[%s4013_s20 + $0xa8] sm:$0xff] %v1946_v58 }
 0x24a   : > { %2154 = vst [vmem:[%s4013_s20 + $0xe0] sm:$0xff] %v1870_v54 }
 0x24c   : > { %v1947_v46 = vpop.f32.mrf.mxu3  ;;  %v1908_v41 = vpop.f32.mrf.mxu2 }
 0x24d   : > { %v1833_v47 = vpop.f32.mrf.mxu0  ;;  %v1909_v62 = vadd.f32 %v1908_v41, %v4170_v35  ;;  %v1872_v19 = vpop.f32.mrf.mxu1 }
 0x24e   : > { %v1834_v40 = vadd.f32 %v1833_v47, %v4159_v21  ;;  %v3125_v47 = vld [vmem:[#allocation8] sm:$0xff] }
 0x24f   : > { %v1948_v37 = vadd.f32 %v1947_v46, %v1909_v62  ;;  %v4228_v62 = vperm.slane %v3125_v47, 6 }
 0x250   : > { %v1873_v0 = vadd.f32 %v1872_v19, %v1834_v40  ;;  %1998 = vmatmul.bf16.gmra.mxu0 %v3950_v25  ;;  %2037 = vmatmul.bf16.gmra.mxu1 %v3952_v9 }
 0x251   : > { %2115 = vmatmul.bf16.gmra.mxu3 %v3952_v9  ;;  %2155 = vst [vmem:[%s4013_s20 + $0xe8] sm:$0xff] %v1948_v37  ;;  %2076 = vmatmul.bf16.gmra.mxu2 %v3950_v25 }
 0x252   : > { %2162 = vst [vmem:[%s4013_s20 + $0x120] sm:$0xff] %v1873_v0 }
 0x254   : > { %v1950_v18 = vpop.f32.mrf.mxu3  ;;  %v1911_v38 = vpop.f32.mrf.mxu2 }
 0x255   : > { %v1835_v27 = vpop.f32.mrf.mxu0  ;;  %v1912_v60 = vadd.f32 %v1911_v38, %v4170_v35  ;;  %v1874_v57 = vpop.f32.mrf.mxu1 }
 0x256   : > { %v1836_v28 = vadd.f32 %v1835_v27, %v4159_v21 }
 0x257   : > { %v1951_v56 = vadd.f32 %v1950_v18, %v1912_v60  ;;  %v4234_v60 = vperm.slane %v3125_v47, 7 }
 0x258   : > { %v1875_v26 = vadd.f32 %v1874_v57, %v1836_v28 }
 0x259   : > { %2163 = vst [vmem:[%s4013_s20 + $0x128] sm:$0xff] %v1951_v56 }
 0x25a   : > { %2170 = vst [vmem:[%s4013_s20 + $0x160] sm:$0xff] %v1875_v26 }
 0x25c   : > { %v1952_v14 = vpop.f32.mrf.mxu3  ;;  %v1913_v9 = vpop.f32.mrf.mxu2 }
 0x25d   : > { %v1838_v20 = vpop.f32.mrf.mxu0  ;;  %v1914_v25 = vadd.f32 %v1913_v9, %v4170_v35  ;;  %v1877_v32 = vpop.f32.mrf.mxu1 }
 0x25e   : > { %v1839_v31 = vadd.f32 %v1838_v20, %v4159_v21 }
 0x25f   : > { %v1953_v8 = vadd.f32 %v1952_v14, %v1914_v25 }
 0x260   : > { %v1878_v23 = vadd.f32 %v1877_v32, %v1839_v31  ;;  %2003 = vmatmul.bf16.gmra.mxu0 %v3984_v59  ;;  %2042 = vmatmul.bf16.gmra.mxu1 %v3986_v7 }
 0x261   : > { %2120 = vmatmul.bf16.gmra.mxu3 %v3986_v7  ;;  %2171 = vst [vmem:[%s4013_s20 + $0x168] sm:$0xff] %v1953_v8  ;;  %2081 = vmatmul.bf16.gmra.mxu2 %v3984_v59 }
 0x262   : > { %2178 = vst [vmem:[%s4013_s20 + $0x1a0] sm:$0xff] %v1878_v23 }
 0x264   : > { %v1955_v53 = vpop.f32.mrf.mxu3  ;;  %v1916_v42 = vpop.f32.mrf.mxu2 }
 0x265   : > { %v1840_v2 = vpop.f32.mrf.mxu0  ;;  %v1917_v36 = vadd.f32 %v1916_v42, %v4170_v35  ;;  %v1879_v15 = vpop.f32.mrf.mxu1 }
 0x266   : > { %v1841_v44 = vadd.f32 %v1840_v2, %v4159_v21 }
 0x267   : > { %v1956_v33 = vadd.f32 %v1955_v53, %v1917_v36 }
 0x268   : > { %v1880_v34 = vadd.f32 %v1879_v15, %v1841_v44 }
 0x269   : > { %2179 = vst [vmem:[%s4013_s20 + $0x1a8] sm:$0xff] %v1956_v33 }
 0x26a   : > { %2186 = vst [vmem:[%s4013_s20 + $0x1e0] sm:$0xff] %v1880_v34 }
 0x26c   : > { %v1957_v43 = vpop.f32.mrf.mxu3  ;;  %v1918_v7 = vpop.f32.mrf.mxu2 }
 0x26d   : > { %v1843_v17 = vpop.f32.mrf.mxu0  ;;  %v1919_v59 = vadd.f32 %v1918_v7, %v4170_v35  ;;  %v1882_v39 = vpop.f32.mrf.mxu1 }
 0x26e   : > { %v1844_v51 = vadd.f32 %v1843_v17, %v4159_v21 }
 0x26f   : > { %v1958_v48 = vadd.f32 %v1957_v43, %v1919_v59 }
 0x270   : > { %v1883_v10 = vadd.f32 %v1882_v39, %v1844_v51 }
 0x271   : > { %2187 = vst [vmem:[%s4013_s20 + $0x1e8] sm:$0xff] %v1958_v48 }
 0x272   : > { %2194 = vst [vmem:[%s4013_s20 + $0x220] sm:$0xff] %v1883_v10 }
 0x274   : > { %v1960_v13 = vpop.f32.mrf.mxu3  ;;  %v1921_v63 = vpop.f32.mrf.mxu2 }
 0x275   : > { %v1845_v55 = vpop.f32.mrf.mxu0  ;;  %v1922_v16 = vadd.f32 %v1921_v63, %v4170_v35  ;;  %v1884_v11 = vpop.f32.mrf.mxu1 }
 0x276   : > { %v1846_v4 = vadd.f32 %v1845_v55, %v4159_v21 }
 0x277   : > { %v1961_v52 = vadd.f32 %v1960_v13, %v1922_v16 }
 0x278   : > { %v1885_v45 = vadd.f32 %v1884_v11, %v1846_v4 }
 0x279   : > { %2195 = vst [vmem:[%s4013_s20 + $0x228] sm:$0xff] %v1961_v52 }
 0x27a   : > { %2202 = vst [vmem:[%s4013_s20 + $0x260] sm:$0xff] %v1885_v45 }
 0x27c   : > { %v1962_v22 = vpop.f32.mrf.mxu3  ;;  %v1923_v6 = vpop.f32.mrf.mxu2 }
 0x27d   : > { %v1848_v24 = vpop.f32.mrf.mxu0  ;;  %v1924_v29 = vadd.f32 %v1923_v6, %v4170_v35  ;;  %v1887_v5 = vpop.f32.mrf.mxu1 }
 0x27e   : > { %v1849_v50 = vadd.f32 %v1848_v24, %v4159_v21 }
 0x27f   : > { %v1963_v61 = vadd.f32 %v1962_v22, %v1924_v29 }
 0x280   : > { %v1888_v30 = vadd.f32 %v1887_v5, %v1849_v50 }
 0x281   : > { %2203 = vst [vmem:[%s4013_s20 + $0x268] sm:$0xff] %v1963_v61 }
 0x282   : > { %2210 = vst [vmem:[%s4013_s20 + $0x2a0] sm:$0xff] %v1888_v30 }
 0x284   : > { %v1965_v12 = vpop.f32.mrf.mxu3  ;;  %v1926_v49 = vpop.f32.mrf.mxu2 }
 0x285   : > { %v1850_v1 = vpop.f32.mrf.mxu0  ;;  %v1927_v3 = vadd.f32 %v1926_v49, %v4170_v35  ;;  %v1889_v54 = vpop.f32.mrf.mxu1 }
 0x286   : > { %v1851_v58 = vadd.f32 %v1850_v1, %v4159_v21 }
 0x287   : > { %v1966_v46 = vadd.f32 %v1965_v12, %v1927_v3 }
 0x288   : > { %v1890_v41 = vadd.f32 %v1889_v54, %v1851_v58 }
 0x289   : > { %2211 = vst [vmem:[%s4013_s20 + $0x2a8] sm:$0xff] %v1966_v46 }
 0x28a   : > { %2218 = vst [vmem:[%s4013_s20 + $0x2e0] sm:$0xff] %v1890_v41 }
 0x28c   : > { %v1967_v40 = vpop.f32.mrf.mxu3  ;;  %v1928_v19 = vpop.f32.mrf.mxu2 }
 0x28d   : > { %v1979_v37 = vpop.f32.mrf.mxu0  ;;  %v1929_v0 = vadd.f32 %v1928_v19, %v4170_v35  ;;  %v2018_v21 = vpop.f32.mrf.mxu1 }
 0x28e   : > { %v1980_v18 = vadd.f32 %v1979_v37, %v4228_v62 }
 0x28f   : > { %v1968_v38 = vadd.f32 %v1967_v40, %v1929_v0 }
 0x290   : > { %v2019_v27 = vadd.f32 %v2018_v21, %v1980_v18 }
 0x291   : > { %2219 = vst [vmem:[%s4013_s20 + $0x2e8] sm:$0xff] %v1968_v38 }
 0x292   : > { %2132 = vst [vmem:[%s4013_s20 + $0x30] sm:$0xff] %v2019_v27 }
 0x294   : > { %v2096_v28 = vpop.f32.mrf.mxu3  ;;  %v2057_v57 = vpop.f32.mrf.mxu2 }
 0x295   : > { %v1981_v56 = vpop.f32.mrf.mxu0  ;;  %v2058_v26 = vadd.f32 %v2057_v57, %v4234_v60  ;;  %v2020_v14 = vpop.f32.mrf.mxu1 }
 0x296   : > { %v1982_v35 = vadd.f32 %v1981_v56, %v4228_v62 }
 0x297   : > { %v2097_v9 = vadd.f32 %v2096_v28, %v2058_v26 }
 0x298   : > { %v2021_v20 = vadd.f32 %v2020_v14, %v1982_v35 }
 0x299   : > { %2133 = vst [vmem:[%s4013_s20 + $0x38] sm:$0xff] %v2097_v9 }
 0x29a   : > { %2140 = vst [vmem:[%s4013_s20 + $0x70] sm:$0xff] %v2021_v20 }
 0x29c   : > { %v2098_v25 = vpop.f32.mrf.mxu3  ;;  %v2059_v31 = vpop.f32.mrf.mxu2 }
 0x29d   : > { %v1984_v32 = vpop.f32.mrf.mxu0  ;;  %v2060_v8 = vadd.f32 %v2059_v31, %v4234_v60  ;;  %v2023_v53 = vpop.f32.mrf.mxu1 }
 0x29e   : > { %v1985_v23 = vadd.f32 %v1984_v32, %v4228_v62 }
 0x29f   : > { %v2099_v42 = vadd.f32 %v2098_v25, %v2060_v8 }
 0x2a0   : > { %v2024_v2 = vadd.f32 %v2023_v53, %v1985_v23 }
 0x2a1   : > { %2141 = vst [vmem:[%s4013_s20 + $0x78] sm:$0xff] %v2099_v42 }
 0x2a2   : > { %2148 = vst [vmem:[%s4013_s20 + $0xb0] sm:$0xff] %v2024_v2 }
 0x2a4   : > { %v2101_v36 = vpop.f32.mrf.mxu3  ;;  %v2062_v44 = vpop.f32.mrf.mxu2 }
 0x2a5   : > { %v1986_v15 = vpop.f32.mrf.mxu0  ;;  %v2063_v33 = vadd.f32 %v2062_v44, %v4234_v60  ;;  %v2025_v43 = vpop.f32.mrf.mxu1 }
 0x2a6   : > { %v1987_v34 = vadd.f32 %v1986_v15, %v4228_v62 }
 0x2a7   : > { %v2102_v7 = vadd.f32 %v2101_v36, %v2063_v33 }
 0x2a8   : > { %v2026_v17 = vadd.f32 %v2025_v43, %v1987_v34 }
 0x2a9   : > { %2149 = vst [vmem:[%s4013_s20 + $0xb8] sm:$0xff] %v2102_v7 }
 0x2aa   : > { %2156 = vst [vmem:[%s4013_s20 + $0xf0] sm:$0xff] %v2026_v17 }
 0x2ac   : > { %v2103_v59 = vpop.f32.mrf.mxu3  ;;  %v2064_v51 = vpop.f32.mrf.mxu2 }
 0x2ad   : > { %v1989_v39 = vpop.f32.mrf.mxu0  ;;  %v2065_v48 = vadd.f32 %v2064_v51, %v4234_v60  ;;  %v2028_v13 = vpop.f32.mrf.mxu1 }
 0x2ae   : > { %v1990_v10 = vadd.f32 %v1989_v39, %v4228_v62 }
 0x2af   : > { %v2104_v63 = vadd.f32 %v2103_v59, %v2065_v48 }
 0x2b0   : > { %v2029_v55 = vadd.f32 %v2028_v13, %v1990_v10 }
 0x2b1   : > { %2157 = vst [vmem:[%s4013_s20 + $0xf8] sm:$0xff] %v2104_v63 }
 0x2b2   : > { %2164 = vst [vmem:[%s4013_s20 + $0x130] sm:$0xff] %v2029_v55 }
 0x2b4   : > { %v2106_v16 = vpop.f32.mrf.mxu3  ;;  %v2067_v4 = vpop.f32.mrf.mxu2 }
 0x2b5   : > { %v1991_v11 = vpop.f32.mrf.mxu0  ;;  %v2068_v52 = vadd.f32 %v2067_v4, %v4234_v60  ;;  %v2030_v22 = vpop.f32.mrf.mxu1 }
 0x2b6   : > { %v1992_v45 = vadd.f32 %v1991_v11, %v4228_v62 }
 0x2b7   : > { %v2107_v6 = vadd.f32 %v2106_v16, %v2068_v52 }
 0x2b8   : > { %v2031_v24 = vadd.f32 %v2030_v22, %v1992_v45 }
 0x2b9   : > { %2165 = vst [vmem:[%s4013_s20 + $0x138] sm:$0xff] %v2107_v6 }
 0x2ba   : > { %2172 = vst [vmem:[%s4013_s20 + $0x170] sm:$0xff] %v2031_v24 }
 0x2bc   : > { %v2108_v29 = vpop.f32.mrf.mxu3  ;;  %v2069_v50 = vpop.f32.mrf.mxu2 }
 0x2bd   : > { %v1994_v5 = vpop.f32.mrf.mxu0  ;;  %v2070_v61 = vadd.f32 %v2069_v50, %v4234_v60  ;;  %v2033_v12 = vpop.f32.mrf.mxu1 }
 0x2be   : > { %v1995_v30 = vadd.f32 %v1994_v5, %v4228_v62 }
 0x2bf   : > { %v2109_v49 = vadd.f32 %v2108_v29, %v2070_v61 }
 0x2c0   : > { %v2034_v1 = vadd.f32 %v2033_v12, %v1995_v30 }
 0x2c1   : > { %2173 = vst [vmem:[%s4013_s20 + $0x178] sm:$0xff] %v2109_v49 }
 0x2c2   : > { %2180 = vst [vmem:[%s4013_s20 + $0x1b0] sm:$0xff] %v2034_v1 }
 0x2c4   : > { %v2111_v3 = vpop.f32.mrf.mxu3  ;;  %v2072_v58 = vpop.f32.mrf.mxu2 }
 0x2c5   : > { %v1996_v54 = vpop.f32.mrf.mxu0  ;;  %v2073_v46 = vadd.f32 %v2072_v58, %v4234_v60  ;;  %v2035_v47 = vpop.f32.mrf.mxu1 }
 0x2c6   : > { %v1997_v41 = vadd.f32 %v1996_v54, %v4228_v62 }
 0x2c7   : > { %v2112_v40 = vadd.f32 %v2111_v3, %v2073_v46 }
 0x2c8   : > { %v2036_v19 = vadd.f32 %v2035_v47, %v1997_v41 }
 0x2c9   : > { %2181 = vst [vmem:[%s4013_s20 + $0x1b8] sm:$0xff] %v2112_v40 }
 0x2ca   : > { %2188 = vst [vmem:[%s4013_s20 + $0x1f0] sm:$0xff] %v2036_v19 }
 0x2cc   : > { %v2113_v37 = vpop.f32.mrf.mxu3  ;;  %v2074_v0 = vpop.f32.mrf.mxu2 }
 0x2cd   : > { %v1999_v18 = vpop.f32.mrf.mxu0  ;;  %v2075_v21 = vadd.f32 %v2074_v0, %v4234_v60  ;;  %v2038_v27 = vpop.f32.mrf.mxu1 }
 0x2ce   : > { %v2000_v38 = vadd.f32 %v1999_v18, %v4228_v62 }
 0x2cf   : > { %v2114_v28 = vadd.f32 %v2113_v37, %v2075_v21 }
 0x2d0   : > { %v2039_v57 = vadd.f32 %v2038_v27, %v2000_v38 }
 0x2d1   : > { %2189 = vst [vmem:[%s4013_s20 + $0x1f8] sm:$0xff] %v2114_v28 }
 0x2d2   : > { %2196 = vst [vmem:[%s4013_s20 + $0x230] sm:$0xff] %v2039_v57 }
 0x2d4   : > { %v2116_v56 = vpop.f32.mrf.mxu3  ;;  %v2077_v26 = vpop.f32.mrf.mxu2 }
 0x2d5   : > { %v2001_v35 = vpop.f32.mrf.mxu0  ;;  %v2078_v14 = vadd.f32 %v2077_v26, %v4234_v60  ;;  %v2040_v20 = vpop.f32.mrf.mxu1 }
 0x2d6   : > { %v2002_v9 = vadd.f32 %v2001_v35, %v4228_v62 }
 0x2d7   : > { %v2117_v25 = vadd.f32 %v2116_v56, %v2078_v14 }
 0x2d8   : > { %v2041_v31 = vadd.f32 %v2040_v20, %v2002_v9 }
 0x2d9   : > { %2197 = vst [vmem:[%s4013_s20 + $0x238] sm:$0xff] %v2117_v25 }
 0x2da   : > { %2204 = vst [vmem:[%s4013_s20 + $0x270] sm:$0xff] %v2041_v31 }
 0x2dc   : > { %v2118_v32 = vpop.f32.mrf.mxu3  ;;  %v2079_v8 = vpop.f32.mrf.mxu2 }
 0x2dd   : > { %v2004_v23 = vpop.f32.mrf.mxu0  ;;  %v2080_v53 = vadd.f32 %v2079_v8, %v4234_v60  ;;  %v2043_v2 = vpop.f32.mrf.mxu1 }
 0x2de   : > { %v2005_v42 = vadd.f32 %v2004_v23, %v4228_v62 }
 0x2df   : > { %v2119_v36 = vadd.f32 %v2118_v32, %v2080_v53 }
 0x2e0   : > { %v2044_v44 = vadd.f32 %v2043_v2, %v2005_v42 }
 0x2e1   : > { %2205 = vst [vmem:[%s4013_s20 + $0x278] sm:$0xff] %v2119_v36 }
 0x2e2   : > { %2212 = vst [vmem:[%s4013_s20 + $0x2b0] sm:$0xff] %v2044_v44 }
 0x2e4   : > { %v2121_v15 = vpop.f32.mrf.mxu3  ;;  %v2082_v33 = vpop.f32.mrf.mxu2 }
 0x2e5   : > { %v2006_v34 = vpop.f32.mrf.mxu0  ;;  %v2083_v43 = vadd.f32 %v2082_v33, %v4234_v60  ;;  %v2045_v17 = vpop.f32.mrf.mxu1 }
 0x2e6   : > { %v2007_v7 = vadd.f32 %v2006_v34, %v4228_v62 }
 0x2e7   : > { %v2122_v59 = vadd.f32 %v2121_v15, %v2083_v43 }
 0x2e8   : > { %v2046_v51 = vadd.f32 %v2045_v17, %v2007_v7 }
 0x2e9   : > { %2213 = vst [vmem:[%s4013_s20 + $0x2b8] sm:$0xff] %v2122_v59 }
 0x2ea   : > { %2220 = vst [vmem:[%s4013_s20 + $0x2f0] sm:$0xff] %v2046_v51 }
 0x2ec   : > { %v2084_v39 = vpop.f32.mrf.mxu2  ;;  %v2123_v10 = vpop.f32.mrf.mxu3 }
 0x2ed   : > { %v2085_v48 = vadd.f32 %v2084_v39, %v4234_v60 }
 0x2ef   : > { %v2124_v62 = vadd.f32 %v2123_v10, %v2085_v48 }
 0x2f1   : > { %2221 = vst [vmem:[%s4013_s20 + $0x2f8] sm:$0xff] %v2124_v62 }
 0x2f2   : > { %3273 = shalt.err (!%p3270_p10)
}
 0x2f3   : > { %s3332_s14 = smov 1024   ;;  %s3333_s12 = smov 64  }
 0x2f4   : > { %3035 = dma.vmem_to_hbm [thread:$0]  (%p3424_p0), %s2237_s28, 12288, %s2239_s29, %s2223_s19, %s3332_s14, %s3332_s14, %s3333_s12  }
 0x2f5 PF: > { %p3060_p11 = scmp.ge.s32.totalorder %s3324_s18, 2  ;;  %s2253_s24 = sand.u32 1, %s3312_s15  }
 0x2f6   : > { %s2254_s26 = scalar_lea.sflag [#allocation4], %s2253_s24 }
 0x2f7   : > { %p3052_p12 = pnand %p3060_p11, %p3394_p6 }
 0x2f9   : > { %p3053_p13 = pneg %p3052_p12 }
 0x2fb   : > { %3307 = dma.done.wait (%p3053_p13), %s2254_s26, 12288  }
 0x2fc   : > { %3309 = vsyncadd (%p3053_p13), %s2254_s26, 4294955008  ;;  %s4343_s25 = sld [smem:[#allocation16_spill]]  ;;  %p21_p3 = scmp.ge.s32.totalorder %s3414_s10, 6  }
 0x2fd   : > { %s4344_s15 = smov %s3316_s16  ;;  %s4345_s16 = smov %s3320_s17 }
 0x2fe   : > { %s4347_s18 = smov %s3414_s10  ;;  %23 = sbr.rel (!%p21_p3) target bundleno = 11 (0xb), region = 102 }
 0x302   : > { %s4346_s17 = smov %s4343_s25 }
 0x303   :  { %2260 = vsyncpa [#allocation3], 1 }
 0x304   :  { %2262 = vsyncpa [#allocation3 + $0x1], 1 }
 0x305   :  { %2263 = vsyncpa [#allocation6], 1 }
 0x306   :  { %2265 = vsyncpa [#allocation6 + $0x1], 1 }
 0x307   :  { %2266 = vsyncpa [#allocation9], 1 }
 0x308   :  { %2267 = vsyncpa [#allocation4], 1 }
 0x309   :  { %2269 = vsyncpa [#allocation4 + $0x1], 1 }

</bundles_post_ra>
